<compile_context>
chip_gen: v5e
topology: v5e:2x2
jax: 0.10.0
libtpu: 0.0.40
codegen_flags: <defaults>
</compile_context>

<pallas_src>
import numpy as np

import jax
import jax.numpy as jnp
from jax.experimental import pallas as pl
from jax.experimental.pallas import tpu as pltpu

# ---------------- small synthetic CANINE configuration ----------------------
HIDDEN = 32
NUM_HASHES = 8
SHARD = HIDDEN // NUM_HASHES
NUM_BUCKETS = 16
N_HASH_COLS = NUM_HASHES * NUM_BUCKETS          # 128 (= one lane width)
NUM_HEADS = 2
HEAD_DIM = HIDDEN // NUM_HEADS
INTERMEDIATE = 64
NUM_DEEP_LAYERS = 2                              # canine-s uses 12; small synthetic stack
DOWNSAMPLE_RATE = 4
SEQ_LEN = 16
N_MOL = SEQ_LEN // DOWNSAMPLE_RATE               # molecules per batch element
N_CLASSES = 5
LN_EPS = 1e-12
PRIMES = (31, 43, 59, 61, 73, 97, 103, 113)      # CANINE hash primes
SCALE = 1.0 / (HEAD_DIM ** 0.5)
LANE = 128
NEG_BIAS = -1e4                                   # finite mask value (exp underflows to 0)

# ---------------- packed-slab layout (static ints shared by packer & kernel) --
N_LAYERS = 1 + NUM_DEEP_LAYERS                   # shallow char layer + deep molecule layers
LAYER_W_ROWS = 2 * NUM_HEADS * HIDDEN + HIDDEN + INTERMEDIATE   # A_h,B_h blocks + w_fi + w_fo
FI_ROW = 2 * NUM_HEADS * HIDDEN                  # offset of w_fi inside a layer block
FO_ROW = FI_ROW + HIDDEN                         # offset of w_fo inside a layer block
W_HASH_OFF = 0
LAYER_W_OFF = tuple(N_HASH_COLS + i * LAYER_W_ROWS for i in range(N_LAYERS))
CONV_OFF = N_HASH_COLS + N_LAYERS * LAYER_W_ROWS
POOL_OFF = CONV_OFF + DOWNSAMPLE_RATE * HIDDEN
CLS_OFF = POOL_OFF + HIDDEN
W_ROWS = CLS_OFF + HIDDEN                        # 992 rows x 128 lanes (~0.5 MB f32)

POS_OFF = 0                                      # pos+type embeddings (SEQ_LEN rows)
EMB_LN_OFF = POS_OFF + SEQ_LEN
LAYER_B_ROWS = 7                                 # b_o, ln1_g, ln1_b, b_fi, b_fo, ln2_g, ln2_b
LAYER_B_OFF = tuple(EMB_LN_OFF + 2 + i * LAYER_B_ROWS for i in range(N_LAYERS))
CONV_B_OFF = LAYER_B_OFF[-1] + LAYER_B_ROWS
C2M_LN_OFF = CONV_B_OFF + 1
POOL_B_OFF = C2M_LN_OFF + 2
CLS_B_OFF = POOL_B_OFF + 1
B_ROWS = CLS_B_OFF + 1                           # 44 rows x 128 lanes


# ---------------- in-kernel helpers -------------------------------------------
def _layernorm(x, g, b):
    # single-pass LN: var = E[x^2] - mean^2 (two independent cross-lane reduces)
    mu = jnp.mean(x, axis=-1, keepdims=True)
    ex2 = jnp.mean(x * x, axis=-1, keepdims=True)
    var = ex2 - mu * mu
    return (x - mu) * jax.lax.rsqrt(var + LN_EPS) * g + b


def _xf_layer(x, key_bias, w_ref, b_ref, woff, boff):
    """One post-LN transformer layer on (rows, HIDDEN) activations of ONE batch.

    key_bias is a (1, rows) additive key bias (-1e4 on padded keys, 0 otherwise).
    Weights are the folded per-head matrices A_h = Wq_h Wk_h^T and B_h = Wv_h Wo_h,
    so no 16-wide head slices at non-zero lane offsets are ever taken.
    """
    attn = b_ref[boff:boff + 1, 0:HIDDEN]                                  # b_o, (1, H)
    for h in range(NUM_HEADS):
        a_h = w_ref[woff + h * HIDDEN: woff + (h + 1) * HIDDEN, 0:HIDDEN]
        b_h = w_ref[woff + (NUM_HEADS + h) * HIDDEN:
                    woff + (NUM_HEADS + h + 1) * HIDDEN, 0:HIDDEN]
        xa = jnp.dot(x, a_h, preferred_element_type=jnp.float32)           # (rows, H)
        s = jnp.einsum("qd,kd->qk", xa, x,
                       preferred_element_type=jnp.float32) * SCALE         # q Wq Wk^T k^T / sqrt(d)
        s = s + key_bias
        # no max-subtraction: unmasked scores are O(0.1); exp(-1e4) underflows to 0
        p = jnp.exp(s)
        p = p * pl.reciprocal(jnp.sum(p, axis=-1, keepdims=True), approx=True)
        ctx = jnp.dot(p, x, preferred_element_type=jnp.float32)            # (rows, H)
        attn = attn + jnp.dot(ctx, b_h, preferred_element_type=jnp.float32)

    x = _layernorm(x + attn,
                   b_ref[boff + 1:boff + 2, 0:HIDDEN],
                   b_ref[boff + 2:boff + 3, 0:HIDDEN])

    w_fi = w_ref[woff + FI_ROW: woff + FI_ROW + HIDDEN, 0:INTERMEDIATE]
    b_fi = b_ref[boff + 3:boff + 4, 0:INTERMEDIATE]
    w_fo = w_ref[woff + FO_ROW: woff + FO_ROW + INTERMEDIATE, 0:HIDDEN]
    b_fo = b_ref[boff + 4:boff + 5, 0:HIDDEN]
    # TODO(synk): PyTorch nn.GELU / HF CANINE use exact erf GELU; tanh approximation here.
    mid = jax.nn.gelu(jnp.dot(x, w_fi, preferred_element_type=jnp.float32) + b_fi)
    ffn = jnp.dot(mid, w_fo, preferred_element_type=jnp.float32) + b_fo
    return _layernorm(x + ffn,
                      b_ref[boff + 5:boff + 6, 0:HIDDEN],
                      b_ref[boff + 6:boff + 7, 0:HIDDEN])


# ---------------- the fused per-batch kernel ----------------------------------
def _fused_forward_kernel(ids_ref, kbias_ref, w_ref, b_ref, out_ref):
    ids = ids_ref[0]                                   # (S, 1) int32
    kb = kbias_ref[0]                                  # (2, 128) f32 additive key biases
    char_bias = kb[0:1, 0:SEQ_LEN]                     # (1, S)
    mol_bias = kb[1:2, 0:N_MOL]                        # (1, M)

    # ---- CanineEmbeddings: hash buckets as one-hot x block-diag matmul ----
    col = jax.lax.broadcasted_iota(jnp.int32, (SEQ_LEN, N_HASH_COLS), 1)
    prime = jnp.zeros_like(col)
    for i, pv in enumerate(PRIMES):                    # per-column prime, built on VPU
        in_range = (col >= i * NUM_BUCKETS) & (col < (i + 1) * NUM_BUCKETS)
        prime = jnp.where(in_range, jnp.int32(pv), prime)
    target = ((ids + 1) * prime) & (NUM_BUCKETS - 1)
    onehot = (target == (col & (NUM_BUCKETS - 1))).astype(jnp.float32)     # (S, 128)
    x = jnp.dot(onehot, w_ref[W_HASH_OFF:W_HASH_OFF + N_HASH_COLS, 0:HIDDEN],
                preferred_element_type=jnp.float32)                        # (S, H)
    x = x + b_ref[POS_OFF:POS_OFF + SEQ_LEN, 0:HIDDEN]                     # pos + type(0)
    x = _layernorm(x,
                   b_ref[EMB_LN_OFF:EMB_LN_OFF + 1, 0:HIDDEN],
                   b_ref[EMB_LN_OFF + 1:EMB_LN_OFF + 2, 0:HIDDEN])
    # embedding dropout is identity in eval mode

    # ---- initial shallow (1-layer) char encoder ----
    x = _xf_layer(x, char_bias, w_ref, b_ref, LAYER_W_OFF[0], LAYER_B_OFF[0])

    # ---- chars_to_molecules: Conv1d(k=4,s=4) via in-kernel iota-selection matmuls ----
    mrows = jax.lax.broadcasted_iota(jnp.int32, (N_MOL, SEQ_LEN), 0)
    mcols = jax.lax.broadcasted_iota(jnp.int32, (N_MOL, SEQ_LEN), 1)
    down = b_ref[CONV_B_OFF:CONV_B_OFF + 1, 0:HIDDEN]                      # (1, H) -> bcast
    for j in range(DOWNSAMPLE_RATE):
        sel_j = (mcols == DOWNSAMPLE_RATE * mrows + j).astype(jnp.float32)  # (M, S)
        xj = jnp.dot(sel_j, x, preferred_element_type=jnp.float32)          # (M, H)
        down = down + jnp.dot(
            xj, w_ref[CONV_OFF + j * HIDDEN: CONV_OFF + (j + 1) * HIDDEN, 0:HIDDEN],
            preferred_element_type=jnp.float32)
    down = jax.nn.gelu(down)

    # molecule 0 = CLS char encoding; molecules 1.. = downsampled (drop last)
    sel_cls = ((mrows == 0) & (mcols == 0)).astype(jnp.float32)             # (M, S)
    drows = jax.lax.broadcasted_iota(jnp.int32, (N_MOL, N_MOL), 0)
    dcols = jax.lax.broadcasted_iota(jnp.int32, (N_MOL, N_MOL), 1)
    sel_down = (drows == dcols + 1).astype(jnp.float32)                     # (M, M) sub-diag
    mol = (jnp.dot(sel_cls, x, preferred_element_type=jnp.float32)
           + jnp.dot(sel_down, down, preferred_element_type=jnp.float32))
    mol = _layernorm(mol,
                     b_ref[C2M_LN_OFF:C2M_LN_OFF + 1, 0:HIDDEN],
                     b_ref[C2M_LN_OFF + 1:C2M_LN_OFF + 2, 0:HIDDEN])

    # ---- deep molecule encoder ----
    for li in range(NUM_DEEP_LAYERS):
        mol = _xf_layer(mol, mol_bias, w_ref, b_ref,
                        LAYER_W_OFF[1 + li], LAYER_B_OFF[1 + li])

    # ---- CaninePooler: tanh(dense(molecule CLS)) ----
    pooled = jnp.tanh(
        jnp.dot(mol[0:1, :], w_ref[POOL_OFF:POOL_OFF + HIDDEN, 0:HIDDEN],
                preferred_element_type=jnp.float32)
        + b_ref[POOL_B_OFF:POOL_B_OFF + 1, 0:HIDDEN])

    # ---- classifier head: self.drop (identity in eval) then self.out Linear ----
    # TODO(synk): nn.Dropout(p=dropout_rate) is stochastic in train mode; eval-mode identity here.
    logits = (jnp.dot(pooled, w_ref[CLS_OFF:CLS_OFF + HIDDEN, 0:LANE],
                      preferred_element_type=jnp.float32)
              + b_ref[CLS_B_OFF:CLS_B_OFF + 1, 0:LANE])                     # (1, 128) lane-dense
    out_ref[0] = logits


# ---------------- parameters (deterministic synthetic init) ------------------
def init_params(key):
    keys = iter(jax.random.split(key, 32))

    def w(shape):
        return 0.02 * jax.random.normal(next(keys), shape, jnp.float32)

    def zeros(shape):
        return jnp.zeros(shape, jnp.float32)

    def ln():
        return (jnp.ones((1, HIDDEN), jnp.float32), zeros((1, HIDDEN)))

    def layer():
        # qkv projection biases are zero in this synthetic init, which lets the packer
        # fold (Wq_h Wk_h^T) and (Wv_h Wo_h) per head with exact equivalence.
        return {
            "w_qkv": w((HIDDEN, 3 * HIDDEN)),
            "w_o": w((HIDDEN, HIDDEN)), "b_o": zeros((1, HIDDEN)),
            "ln1_g": jnp.ones((1, HIDDEN), jnp.float32), "ln1_b": zeros((1, HIDDEN)),
            "w_fi": w((HIDDEN, INTERMEDIATE)), "b_fi": zeros((1, INTERMEDIATE)),
            "w_fo": w((INTERMEDIATE, HIDDEN)), "b_fo": zeros((1, HIDDEN)),
            "ln2_g": jnp.ones((1, HIDDEN), jnp.float32), "ln2_b": zeros((1, HIDDEN)),
        }

    # block-diagonal hash-shard embedding: shard i -> rows [i*16:(i+1)*16], cols [i*4:(i+1)*4]
    w_hash = jnp.zeros((N_HASH_COLS, HIDDEN), jnp.float32)
    for i in range(NUM_HASHES):
        w_hash = w_hash.at[i * NUM_BUCKETS:(i + 1) * NUM_BUCKETS,
                           i * SHARD:(i + 1) * SHARD].set(w((NUM_BUCKETS, SHARD)))

    return {
        "w_hash": w_hash,
        "pos_emb": w((SEQ_LEN, HIDDEN)),
        "type_row": w((1, HIDDEN)),                  # only token_type 0 is ever used
        "emb_ln": ln(),
        "char_layer": layer(),
        # Conv1d(HIDDEN, HIDDEN, kernel=4, stride=4) weight laid out as (4H, H)
        "conv_w": w((DOWNSAMPLE_RATE * HIDDEN, HIDDEN)),
        "conv_b": zeros((1, HIDDEN)),
        "c2m_ln": ln(),
        "deep_layers": [layer() for _ in range(NUM_DEEP_LAYERS)],
        "pooler_w": w((HIDDEN, HIDDEN)), "pooler_b": zeros((1, HIDDEN)),
        "cls_w": w((HIDDEN, N_CLASSES)), "cls_b": zeros((1, N_CLASSES)),
    }


def pack_params(params):
    """One-time packing of all weights into two lane-dense slabs (done outside jit)."""
    wslab = np.zeros((W_ROWS, LANE), np.float32)
    bslab = np.zeros((B_ROWS, LANE), np.float32)

    def putw(row, mat):
        mat = np.asarray(mat, np.float32)
        wslab[row:row + mat.shape[0], :mat.shape[1]] = mat

    def putb(row, vec):
        vec = np.asarray(vec, np.float32).reshape(1, -1)
        bslab[row:row + 1, :vec.shape[1]] = vec

    putw(W_HASH_OFF, params["w_hash"])
    layers = [params["char_layer"]] + list(params["deep_layers"])
    for li, lp in enumerate(layers):
        base, bb = LAYER_W_OFF[li], LAYER_B_OFF[li]
        wqkv = np.asarray(lp["w_qkv"], np.float32)
        wq, wk, wv = wqkv[:, :HIDDEN], wqkv[:, HIDDEN:2 * HIDDEN], wqkv[:, 2 * HIDDEN:]
        wo = np.asarray(lp["w_o"], np.float32)
        for h in range(NUM_HEADS):
            hs = slice(h * HEAD_DIM, (h + 1) * HEAD_DIM)
            putw(base + h * HIDDEN, wq[:, hs] @ wk[:, hs].T)               # A_h
            putw(base + (NUM_HEADS + h) * HIDDEN, wv[:, hs] @ wo[hs, :])   # B_h
        putw(base + FI_ROW, lp["w_fi"])
        putw(base + FO_ROW, lp["w_fo"])
        putb(bb + 0, lp["b_o"])
        putb(bb + 1, lp["ln1_g"]); putb(bb + 2, lp["ln1_b"])
        putb(bb + 3, lp["b_fi"]); putb(bb + 4, lp["b_fo"])
        putb(bb + 5, lp["ln2_g"]); putb(bb + 6, lp["ln2_b"])
    putw(CONV_OFF, params["conv_w"])
    putw(POOL_OFF, params["pooler_w"])
    putw(CLS_OFF, params["cls_w"])

    bslab[POS_OFF:POS_OFF + SEQ_LEN, :HIDDEN] = (
        np.asarray(params["pos_emb"], np.float32)
        + np.asarray(params["type_row"], np.float32))
    putb(EMB_LN_OFF, params["emb_ln"][0]); putb(EMB_LN_OFF + 1, params["emb_ln"][1])
    putb(CONV_B_OFF, params["conv_b"])
    putb(C2M_LN_OFF, params["c2m_ln"][0]); putb(C2M_LN_OFF + 1, params["c2m_ln"][1])
    putb(POOL_B_OFF, params["pooler_b"])
    putb(CLS_B_OFF, params["cls_b"])
    return {"wslab": jnp.asarray(wslab), "bslab": jnp.asarray(bslab)}


# ---------------- forward pass (single fused pallas_call, batch grid) ---------
def canine_classifier_forward(packed, input_ids, attention_mask):
    b, s = input_ids.shape
    assert s == SEQ_LEN and s % DOWNSAMPLE_RATE == 0
    m = s // DOWNSAMPLE_RATE

    # tiny wrapper-side mask preprocessing: additive key-bias rows (no O(S^2) matrices)
    maskf = attention_mask.astype(jnp.float32)
    char_bias = (1.0 - maskf) * NEG_BIAS                                        # (B, S)
    mol_bias = (1.0 - maskf.reshape(b, m, DOWNSAMPLE_RATE).max(-1)) * NEG_BIAS  # (B, M)
    kbias = jnp.zeros((b, 2, LANE), jnp.float32)
    kbias = kbias.at[:, 0, :s].set(char_bias)
    kbias = kbias.at[:, 1, :m].set(mol_bias)
    ids3 = input_ids.astype(jnp.int32).reshape(b, s, 1)

    out = pl.pallas_call(
        _fused_forward_kernel,
        grid=(b,),
        in_specs=[
            pl.BlockSpec((1, s, 1), lambda i: (i, 0, 0)),        # per-batch ids
            pl.BlockSpec((1, 2, LANE), lambda i: (i, 0, 0)),     # per-batch key-bias rows
            pl.BlockSpec((W_ROWS, LANE), lambda i: (0, 0)),      # resident weight slab
            pl.BlockSpec((B_ROWS, LANE), lambda i: (0, 0)),      # resident bias/LN slab
        ],
        out_specs=pl.BlockSpec((1, 1, LANE), lambda i: (i, 0, 0)),
        out_shape=jax.ShapeDtypeStruct((b, 1, LANE), jnp.float32),
        compiler_params=pltpu.CompilerParams(
            # batch is split across TensorCores on v7x; weights keep a constant
            # block index so they are not re-DMA'd between consecutive steps.
            dimension_semantics=("parallel",)),
    )(ids3, kbias, packed["wslab"], packed["bslab"])
    return out[:, 0, :N_CLASSES]


# ---------------- demo --------------------------------------------------------
if __name__ == "__main__":
    key = jax.random.PRNGKey(0)
    pkey, ikey = jax.random.split(key)
    params = init_params(pkey)
    packed = pack_params(params)

    batch = 2
    input_ids = jax.random.randint(ikey, (batch, SEQ_LEN), 0, 1000, dtype=jnp.int32)
    attention_mask = jnp.concatenate(
        [jnp.ones((batch, SEQ_LEN - 4), jnp.int32),
         jnp.array([[1, 1, 1, 1], [0, 0, 0, 0]], jnp.int32)], axis=1)

    fwd = jax.jit(canine_classifier_forward)
    logits = fwd(packed, input_ids, attention_mask)
    jax.block_until_ready(logits)
    assert logits.shape == (batch, N_CLASSES)
    assert bool(jnp.all(jnp.isfinite(logits)))
    print("KERNEL_OK")
</pallas_src>

<mosaic_0001>
module attributes {stable_mosaic.version = 11 : i64} {
  func.func @_fused_forward_kernel(%arg0: i32, %arg1: memref<1x16x1xi32, #tpu.memory_space<vmem>>, %arg2: memref<1x2x128xf32, #tpu.memory_space<vmem>>, %arg3: memref<992x128xf32, #tpu.memory_space<vmem>>, %arg4: memref<44x128xf32, #tpu.memory_space<vmem>>, %arg5: memref<1x1x128xf32, #tpu.memory_space<vmem>>) attributes {dimension_semantics = [#tpu.dimension_semantics<parallel>], iteration_bounds = array<i64: 2>, scalar_prefetch = 0 : i64, scratch_operands = 0 : i64, tpu.core_type = #tpu.core_type<tc>, window_params = [{transform_indices = @transform_0, window_bounds = array<i64: 1, 16, 1>}, {transform_indices = @transform_1, window_bounds = array<i64: 1, 2, 128>}, {pipeline_mode = #tpu.pipeline_mode<synchronous>, transform_indices = @transform_2, window_bounds = array<i64: 992, 128>}, {pipeline_mode = #tpu.pipeline_mode<synchronous>, transform_indices = @transform_3, window_bounds = array<i64: 44, 128>}, {transform_indices = @transform_4, window_bounds = array<i64: 1, 1, 128>}]} {
    %c0 = arith.constant 0 : index
    %c0_0 = arith.constant 0 : index
    %c0_1 = arith.constant 0 : index
    %0 = vector.load %arg1[%c0, %c0_0, %c0_1] : memref<1x16x1xi32, #tpu.memory_space<vmem>>, vector<1x16x1xi32>
    %1 = vector.shape_cast %0 : vector<1x16x1xi32> to vector<16x1xi32>
    %c0_2 = arith.constant 0 : index
    %c0_3 = arith.constant 0 : index
    %c0_4 = arith.constant 0 : index
    %2 = vector.load %arg2[%c0_2, %c0_3, %c0_4] : memref<1x2x128xf32, #tpu.memory_space<vmem>>, vector<1x2x128xf32>
    %3 = vector.shape_cast %2 : vector<1x2x128xf32> to vector<2x128xf32>
    %4 = vector.extract_strided_slice %3 {offsets = [0, 0], sizes = [1, 16], strides = [1, 1]} : vector<2x128xf32> to vector<1x16xf32>
    %5 = vector.extract_strided_slice %3 {offsets = [1, 0], sizes = [1, 4], strides = [1, 1]} : vector<2x128xf32> to vector<1x4xf32>
    %6 = tpu.iota {dimensions = array<i32: 1>} : vector<16x128xi32>
    %c0_i32 = arith.constant 0 : i32
    %7 = vector.broadcast %c0_i32 : i32 to vector<16x128xi32>
    %c0_i32_5 = arith.constant 0 : i32
    %8 = vector.broadcast %c0_i32_5 : i32 to vector<16x128xi32>
    %9 = arith.cmpi sge, %6, %8 : vector<16x128xi32>
    %c16_i32 = arith.constant 16 : i32
    %10 = vector.broadcast %c16_i32 : i32 to vector<16x128xi32>
    %11 = arith.cmpi slt, %6, %10 : vector<16x128xi32>
    %12 = arith.andi %9, %11 : vector<16x128xi1>
    %c31_i32 = arith.constant 31 : i32
    %13 = vector.broadcast %c31_i32 : i32 to vector<16x128xi32>
    %14 = arith.select %12, %13, %7 : vector<16x128xi1>, vector<16x128xi32>
    %c16_i32_6 = arith.constant 16 : i32
    %15 = vector.broadcast %c16_i32_6 : i32 to vector<16x128xi32>
    %16 = arith.cmpi sge, %6, %15 : vector<16x128xi32>
    %c32_i32 = arith.constant 32 : i32
    %17 = vector.broadcast %c32_i32 : i32 to vector<16x128xi32>
    %18 = arith.cmpi slt, %6, %17 : vector<16x128xi32>
    %19 = arith.andi %16, %18 : vector<16x128xi1>
    %c43_i32 = arith.constant 43 : i32
    %20 = vector.broadcast %c43_i32 : i32 to vector<16x128xi32>
    %21 = arith.select %19, %20, %14 : vector<16x128xi1>, vector<16x128xi32>
    %c32_i32_7 = arith.constant 32 : i32
    %22 = vector.broadcast %c32_i32_7 : i32 to vector<16x128xi32>
    %23 = arith.cmpi sge, %6, %22 : vector<16x128xi32>
    %c48_i32 = arith.constant 48 : i32
    %24 = vector.broadcast %c48_i32 : i32 to vector<16x128xi32>
    %25 = arith.cmpi slt, %6, %24 : vector<16x128xi32>
    %26 = arith.andi %23, %25 : vector<16x128xi1>
    %c59_i32 = arith.constant 59 : i32
    %27 = vector.broadcast %c59_i32 : i32 to vector<16x128xi32>
    %28 = arith.select %26, %27, %21 : vector<16x128xi1>, vector<16x128xi32>
    %c48_i32_8 = arith.constant 48 : i32
    %29 = vector.broadcast %c48_i32_8 : i32 to vector<16x128xi32>
    %30 = arith.cmpi sge, %6, %29 : vector<16x128xi32>
    %c64_i32 = arith.constant 64 : i32
    %31 = vector.broadcast %c64_i32 : i32 to vector<16x128xi32>
    %32 = arith.cmpi slt, %6, %31 : vector<16x128xi32>
    %33 = arith.andi %30, %32 : vector<16x128xi1>
    %c61_i32 = arith.constant 61 : i32
    %34 = vector.broadcast %c61_i32 : i32 to vector<16x128xi32>
    %35 = arith.select %33, %34, %28 : vector<16x128xi1>, vector<16x128xi32>
    %c64_i32_9 = arith.constant 64 : i32
    %36 = vector.broadcast %c64_i32_9 : i32 to vector<16x128xi32>
    %37 = arith.cmpi sge, %6, %36 : vector<16x128xi32>
    %c80_i32 = arith.constant 80 : i32
    %38 = vector.broadcast %c80_i32 : i32 to vector<16x128xi32>
    %39 = arith.cmpi slt, %6, %38 : vector<16x128xi32>
    %40 = arith.andi %37, %39 : vector<16x128xi1>
    %c73_i32 = arith.constant 73 : i32
    %41 = vector.broadcast %c73_i32 : i32 to vector<16x128xi32>
    %42 = arith.select %40, %41, %35 : vector<16x128xi1>, vector<16x128xi32>
    %c80_i32_10 = arith.constant 80 : i32
    %43 = vector.broadcast %c80_i32_10 : i32 to vector<16x128xi32>
    %44 = arith.cmpi sge, %6, %43 : vector<16x128xi32>
    %c96_i32 = arith.constant 96 : i32
    %45 = vector.broadcast %c96_i32 : i32 to vector<16x128xi32>
    %46 = arith.cmpi slt, %6, %45 : vector<16x128xi32>
    %47 = arith.andi %44, %46 : vector<16x128xi1>
    %c97_i32 = arith.constant 97 : i32
    %48 = vector.broadcast %c97_i32 : i32 to vector<16x128xi32>
    %49 = arith.select %47, %48, %42 : vector<16x128xi1>, vector<16x128xi32>
    %c96_i32_11 = arith.constant 96 : i32
    %50 = vector.broadcast %c96_i32_11 : i32 to vector<16x128xi32>
    %51 = arith.cmpi sge, %6, %50 : vector<16x128xi32>
    %c112_i32 = arith.constant 112 : i32
    %52 = vector.broadcast %c112_i32 : i32 to vector<16x128xi32>
    %53 = arith.cmpi slt, %6, %52 : vector<16x128xi32>
    %54 = arith.andi %51, %53 : vector<16x128xi1>
    %c103_i32 = arith.constant 103 : i32
    %55 = vector.broadcast %c103_i32 : i32 to vector<16x128xi32>
    %56 = arith.select %54, %55, %49 : vector<16x128xi1>, vector<16x128xi32>
    %c112_i32_12 = arith.constant 112 : i32
    %57 = vector.broadcast %c112_i32_12 : i32 to vector<16x128xi32>
    %58 = arith.cmpi sge, %6, %57 : vector<16x128xi32>
    %c128_i32 = arith.constant 128 : i32
    %59 = vector.broadcast %c128_i32 : i32 to vector<16x128xi32>
    %60 = arith.cmpi slt, %6, %59 : vector<16x128xi32>
    %61 = arith.andi %58, %60 : vector<16x128xi1>
    %c113_i32 = arith.constant 113 : i32
    %62 = vector.broadcast %c113_i32 : i32 to vector<16x128xi32>
    %63 = arith.select %61, %62, %56 : vector<16x128xi1>, vector<16x128xi32>
    %c1_i32 = arith.constant 1 : i32
    %64 = vector.broadcast %c1_i32 : i32 to vector<16x1xi32>
    %65 = arith.addi %1, %64 : vector<16x1xi32>
    %66 = vector.broadcast %65 : vector<16x1xi32> to vector<16x128xi32>
    %67 = arith.muli %66, %63 : vector<16x128xi32>
    %c15_i32 = arith.constant 15 : i32
    %68 = vector.broadcast %c15_i32 : i32 to vector<16x128xi32>
    %69 = arith.andi %67, %68 : vector<16x128xi32>
    %c15_i32_13 = arith.constant 15 : i32
    %70 = vector.broadcast %c15_i32_13 : i32 to vector<16x128xi32>
    %71 = arith.andi %6, %70 : vector<16x128xi32>
    %72 = arith.cmpi eq, %69, %71 : vector<16x128xi32>
    %73 = arith.extui %72 : vector<16x128xi1> to vector<16x128xi32>
    %74 = arith.sitofp %73 : vector<16x128xi32> to vector<16x128xf32>
    %c0_14 = arith.constant 0 : index
    %c0_15 = arith.constant 0 : index
    %75 = vector.load %arg3[%c0_14, %c0_15] : memref<992x128xf32, #tpu.memory_space<vmem>>, vector<128x32xf32>
    %cst = arith.constant dense<0.000000e+00> : vector<16x32xf32>
    %76 = tpu.matmul %74, %75, %cst {dimension_numbers = #tpu.dot_dimension_numbers<[1], [0], [0], [1], [0, 0, 1, 1], [], []>} : vector<16x128xf32>, vector<128x32xf32>, vector<16x32xf32> -> vector<16x32xf32>
    %c0_16 = arith.constant 0 : index
    %c0_17 = arith.constant 0 : index
    %77 = vector.load %arg4[%c0_16, %c0_17] : memref<44x128xf32, #tpu.memory_space<vmem>>, vector<16x32xf32>
    %78 = arith.addf %76, %77 : vector<16x32xf32>
    %c16 = arith.constant 16 : index
    %c0_18 = arith.constant 0 : index
    %79 = vector.load %arg4[%c16, %c0_18] : memref<44x128xf32, #tpu.memory_space<vmem>>, vector<1x32xf32>
    %c17 = arith.constant 17 : index
    %c0_19 = arith.constant 0 : index
    %80 = vector.load %arg4[%c17, %c0_19] : memref<44x128xf32, #tpu.memory_space<vmem>>, vector<1x32xf32>
    %cst_20 = arith.constant dense<0.000000e+00> : vector<16xf32>
    %81 = vector.multi_reduction <add>, %78, %cst_20 [1] : vector<16x32xf32> to vector<16xf32>
    %82 = vector.shape_cast %81 : vector<16xf32> to vector<16x1xf32>
    %cst_21 = arith.constant 3.200000e+01 : f32
    %83 = vector.broadcast %cst_21 : f32 to vector<16x1xf32>
    %84 = arith.divf %82, %83 : vector<16x1xf32>
    %85 = arith.mulf %78, %78 : vector<16x32xf32>
    %cst_22 = arith.constant dense<0.000000e+00> : vector<16xf32>
    %86 = vector.multi_reduction <add>, %85, %cst_22 [1] : vector<16x32xf32> to vector<16xf32>
    %87 = vector.shape_cast %86 : vector<16xf32> to vector<16x1xf32>
    %cst_23 = arith.constant 3.200000e+01 : f32
    %88 = vector.broadcast %cst_23 : f32 to vector<16x1xf32>
    %89 = arith.divf %87, %88 : vector<16x1xf32>
    %90 = arith.mulf %84, %84 : vector<16x1xf32>
    %91 = arith.subf %89, %90 : vector<16x1xf32>
    %92 = vector.broadcast %84 : vector<16x1xf32> to vector<16x32xf32>
    %93 = arith.subf %78, %92 : vector<16x32xf32>
    %cst_24 = arith.constant 9.99999996E-13 : f32
    %94 = vector.broadcast %cst_24 : f32 to vector<16x1xf32>
    %95 = arith.addf %91, %94 : vector<16x1xf32>
    %96 = math.rsqrt %95 : vector<16x1xf32>
    %97 = vector.broadcast %96 : vector<16x1xf32> to vector<16x32xf32>
    %98 = arith.mulf %93, %97 : vector<16x32xf32>
    %99 = vector.broadcast %79 : vector<1x32xf32> to vector<16x32xf32>
    %100 = arith.mulf %98, %99 : vector<16x32xf32>
    %101 = vector.broadcast %80 : vector<1x32xf32> to vector<16x32xf32>
    %102 = arith.addf %100, %101 : vector<16x32xf32>
    %c18 = arith.constant 18 : index
    %c0_25 = arith.constant 0 : index
    %103 = vector.load %arg4[%c18, %c0_25] : memref<44x128xf32, #tpu.memory_space<vmem>>, vector<1x32xf32>
    %c128 = arith.constant 128 : index
    %c0_26 = arith.constant 0 : index
    %104 = vector.load %arg3[%c128, %c0_26] : memref<992x128xf32, #tpu.memory_space<vmem>>, vector<32x32xf32>
    %c192 = arith.constant 192 : index
    %c0_27 = arith.constant 0 : index
    %105 = vector.load %arg3[%c192, %c0_27] : memref<992x128xf32, #tpu.memory_space<vmem>>, vector<32x32xf32>
    %cst_28 = arith.constant dense<0.000000e+00> : vector<16x32xf32>
    %106 = tpu.matmul %102, %104, %cst_28 {dimension_numbers = #tpu.dot_dimension_numbers<[1], [0], [0], [1], [0, 0, 1, 1], [], []>} : vector<16x32xf32>, vector<32x32xf32>, vector<16x32xf32> -> vector<16x32xf32>
    "tpu.trace_start"() <{level = 10 : i32, message = "qd,kd->qk"}> : () -> ()
    %cst_29 = arith.constant dense<0.000000e+00> : vector<16x16xf32>
    %107 = tpu.matmul %106, %102, %cst_29 {dimension_numbers = #tpu.dot_dimension_numbers<[1], [1], [0], [0], [0, 0, 1, 0], [], []>} : vector<16x32xf32>, vector<16x32xf32>, vector<16x16xf32> -> vector<16x16xf32>
    "tpu.trace_stop"() : () -> ()
    %cst_30 = arith.constant 2.500000e-01 : f32
    %108 = vector.broadcast %cst_30 : f32 to vector<16x16xf32>
    %109 = arith.mulf %107, %108 : vector<16x16xf32>
    %110 = vector.broadcast %4 : vector<1x16xf32> to vector<16x16xf32>
    %111 = arith.addf %109, %110 : vector<16x16xf32>
    %112 = math.exp %111 : vector<16x16xf32>
    %cst_31 = arith.constant dense<0.000000e+00> : vector<16xf32>
    %113 = vector.multi_reduction <add>, %112, %cst_31 [1] : vector<16x16xf32> to vector<16xf32>
    %114 = vector.shape_cast %113 : vector<16xf32> to vector<16x1xf32>
    %115 = tpu.reciprocal %114 {approx = true} : vector<16x1xf32> -> vector<16x1xf32>
    %116 = vector.broadcast %115 : vector<16x1xf32> to vector<16x16xf32>
    %117 = arith.mulf %112, %116 : vector<16x16xf32>
    %cst_32 = arith.constant dense<0.000000e+00> : vector<16x32xf32>
    %118 = tpu.matmul %117, %102, %cst_32 {dimension_numbers = #tpu.dot_dimension_numbers<[1], [0], [0], [1], [0, 0, 1, 1], [], []>} : vector<16x16xf32>, vector<16x32xf32>, vector<16x32xf32> -> vector<16x32xf32>
    %cst_33 = arith.constant dense<0.000000e+00> : vector<16x32xf32>
    %119 = tpu.matmul %118, %105, %cst_33 {dimension_numbers = #tpu.dot_dimension_numbers<[1], [0], [0], [1], [0, 0, 1, 1], [], []>} : vector<16x32xf32>, vector<32x32xf32>, vector<16x32xf32> -> vector<16x32xf32>
    %120 = vector.broadcast %103 : vector<1x32xf32> to vector<16x32xf32>
    %121 = arith.addf %120, %119 : vector<16x32xf32>
    %c160 = arith.constant 160 : index
    %c0_34 = arith.constant 0 : index
    %122 = vector.load %arg3[%c160, %c0_34] : memref<992x128xf32, #tpu.memory_space<vmem>>, vector<32x32xf32>
    %c224 = arith.constant 224 : index
    %c0_35 = arith.constant 0 : index
    %123 = vector.load %arg3[%c224, %c0_35] : memref<992x128xf32, #tpu.memory_space<vmem>>, vector<32x32xf32>
    %cst_36 = arith.constant dense<0.000000e+00> : vector<16x32xf32>
    %124 = tpu.matmul %102, %122, %cst_36 {dimension_numbers = #tpu.dot_dimension_numbers<[1], [0], [0], [1], [0, 0, 1, 1], [], []>} : vector<16x32xf32>, vector<32x32xf32>, vector<16x32xf32> -> vector<16x32xf32>
    "tpu.trace_start"() <{level = 10 : i32, message = "qd,kd->qk"}> : () -> ()
    %cst_37 = arith.constant dense<0.000000e+00> : vector<16x16xf32>
    %125 = tpu.matmul %124, %102, %cst_37 {dimension_numbers = #tpu.dot_dimension_numbers<[1], [1], [0], [0], [0, 0, 1, 0], [], []>} : vector<16x32xf32>, vector<16x32xf32>, vector<16x16xf32> -> vector<16x16xf32>
    "tpu.trace_stop"() : () -> ()
    %cst_38 = arith.constant 2.500000e-01 : f32
    %126 = vector.broadcast %cst_38 : f32 to vector<16x16xf32>
    %127 = arith.mulf %125, %126 : vector<16x16xf32>
    %128 = vector.broadcast %4 : vector<1x16xf32> to vector<16x16xf32>
    %129 = arith.addf %127, %128 : vector<16x16xf32>
    %130 = math.exp %129 : vector<16x16xf32>
    %cst_39 = arith.constant dense<0.000000e+00> : vector<16xf32>
    %131 = vector.multi_reduction <add>, %130, %cst_39 [1] : vector<16x16xf32> to vector<16xf32>
    %132 = vector.shape_cast %131 : vector<16xf32> to vector<16x1xf32>
    %133 = tpu.reciprocal %132 {approx = true} : vector<16x1xf32> -> vector<16x1xf32>
    %134 = vector.broadcast %133 : vector<16x1xf32> to vector<16x16xf32>
    %135 = arith.mulf %130, %134 : vector<16x16xf32>
    %cst_40 = arith.constant dense<0.000000e+00> : vector<16x32xf32>
    %136 = tpu.matmul %135, %102, %cst_40 {dimension_numbers = #tpu.dot_dimension_numbers<[1], [0], [0], [1], [0, 0, 1, 1], [], []>} : vector<16x16xf32>, vector<16x32xf32>, vector<16x32xf32> -> vector<16x32xf32>
    %cst_41 = arith.constant dense<0.000000e+00> : vector<16x32xf32>
    %137 = tpu.matmul %136, %123, %cst_41 {dimension_numbers = #tpu.dot_dimension_numbers<[1], [0], [0], [1], [0, 0, 1, 1], [], []>} : vector<16x32xf32>, vector<32x32xf32>, vector<16x32xf32> -> vector<16x32xf32>
    %138 = arith.addf %121, %137 : vector<16x32xf32>
    %139 = arith.addf %102, %138 : vector<16x32xf32>
    %c19 = arith.constant 19 : index
    %c0_42 = arith.constant 0 : index
    %140 = vector.load %arg4[%c19, %c0_42] : memref<44x128xf32, #tpu.memory_space<vmem>>, vector<1x32xf32>
    %c20 = arith.constant 20 : index
    %c0_43 = arith.constant 0 : index
    %141 = vector.load %arg4[%c20, %c0_43] : memref<44x128xf32, #tpu.memory_space<vmem>>, vector<1x32xf32>
    %cst_44 = arith.constant dense<0.000000e+00> : vector<16xf32>
    %142 = vector.multi_reduction <add>, %139, %cst_44 [1] : vector<16x32xf32> to vector<16xf32>
    %143 = vector.shape_cast %142 : vector<16xf32> to vector<16x1xf32>
    %cst_45 = arith.constant 3.200000e+01 : f32
    %144 = vector.broadcast %cst_45 : f32 to vector<16x1xf32>
    %145 = arith.divf %143, %144 : vector<16x1xf32>
    %146 = arith.mulf %139, %139 : vector<16x32xf32>
    %cst_46 = arith.constant dense<0.000000e+00> : vector<16xf32>
    %147 = vector.multi_reduction <add>, %146, %cst_46 [1] : vector<16x32xf32> to vector<16xf32>
    %148 = vector.shape_cast %147 : vector<16xf32> to vector<16x1xf32>
    %cst_47 = arith.constant 3.200000e+01 : f32
    %149 = vector.broadcast %cst_47 : f32 to vector<16x1xf32>
    %150 = arith.divf %148, %149 : vector<16x1xf32>
    %151 = arith.mulf %145, %145 : vector<16x1xf32>
    %152 = arith.subf %150, %151 : vector<16x1xf32>
    %153 = vector.broadcast %145 : vector<16x1xf32> to vector<16x32xf32>
    %154 = arith.subf %139, %153 : vector<16x32xf32>
    %cst_48 = arith.constant 9.99999996E-13 : f32
    %155 = vector.broadcast %cst_48 : f32 to vector<16x1xf32>
    %156 = arith.addf %152, %155 : vector<16x1xf32>
    %157 = math.rsqrt %156 : vector<16x1xf32>
    %158 = vector.broadcast %157 : vector<16x1xf32> to vector<16x32xf32>
    %159 = arith.mulf %154, %158 : vector<16x32xf32>
    %160 = vector.broadcast %140 : vector<1x32xf32> to vector<16x32xf32>
    %161 = arith.mulf %159, %160 : vector<16x32xf32>
    %162 = vector.broadcast %141 : vector<1x32xf32> to vector<16x32xf32>
    %163 = arith.addf %161, %162 : vector<16x32xf32>
    %c256 = arith.constant 256 : index
    %c0_49 = arith.constant 0 : index
    %164 = vector.load %arg3[%c256, %c0_49] : memref<992x128xf32, #tpu.memory_space<vmem>>, vector<32x64xf32>
    %c21 = arith.constant 21 : index
    %c0_50 = arith.constant 0 : index
    %165 = vector.load %arg4[%c21, %c0_50] : memref<44x128xf32, #tpu.memory_space<vmem>>, vector<1x64xf32>
    %c288 = arith.constant 288 : index
    %c0_51 = arith.constant 0 : index
    %166 = vector.load %arg3[%c288, %c0_51] : memref<992x128xf32, #tpu.memory_space<vmem>>, vector<64x32xf32>
    %c22 = arith.constant 22 : index
    %c0_52 = arith.constant 0 : index
    %167 = vector.load %arg4[%c22, %c0_52] : memref<44x128xf32, #tpu.memory_space<vmem>>, vector<1x32xf32>
    %cst_53 = arith.constant dense<0.000000e+00> : vector<16x64xf32>
    %168 = tpu.matmul %163, %164, %cst_53 {dimension_numbers = #tpu.dot_dimension_numbers<[1], [0], [0], [1], [0, 0, 1, 1], [], []>} : vector<16x32xf32>, vector<32x64xf32>, vector<16x64xf32> -> vector<16x64xf32>
    %169 = vector.broadcast %165 : vector<1x64xf32> to vector<16x64xf32>
    %170 = arith.addf %168, %169 : vector<16x64xf32>
    %171 = arith.mulf %170, %170 : vector<16x64xf32>
    %172 = arith.mulf %170, %171 : vector<16x64xf32>
    %cst_54 = arith.constant 4.471500e-02 : f32
    %173 = vector.broadcast %cst_54 : f32 to vector<16x64xf32>
    %174 = arith.mulf %173, %172 : vector<16x64xf32>
    %175 = arith.addf %170, %174 : vector<16x64xf32>
    %cst_55 = arith.constant 0.797884583 : f32
    %176 = vector.broadcast %cst_55 : f32 to vector<16x64xf32>
    %177 = arith.mulf %176, %175 : vector<16x64xf32>
    %178 = math.tanh %177 : vector<16x64xf32>
    %cst_56 = arith.constant 1.000000e+00 : f32
    %179 = vector.broadcast %cst_56 : f32 to vector<16x64xf32>
    %180 = arith.addf %179, %178 : vector<16x64xf32>
    %cst_57 = arith.constant 5.000000e-01 : f32
    %181 = vector.broadcast %cst_57 : f32 to vector<16x64xf32>
    %182 = arith.mulf %181, %180 : vector<16x64xf32>
    %183 = arith.mulf %170, %182 : vector<16x64xf32>
    %cst_58 = arith.constant dense<0.000000e+00> : vector<16x32xf32>
    %184 = tpu.matmul %183, %166, %cst_58 {dimension_numbers = #tpu.dot_dimension_numbers<[1], [0], [0], [1], [0, 0, 1, 1], [], []>} : vector<16x64xf32>, vector<64x32xf32>, vector<16x32xf32> -> vector<16x32xf32>
    %185 = vector.broadcast %167 : vector<1x32xf32> to vector<16x32xf32>
    %186 = arith.addf %184, %185 : vector<16x32xf32>
    %187 = arith.addf %163, %186 : vector<16x32xf32>
    %c23 = arith.constant 23 : index
    %c0_59 = arith.constant 0 : index
    %188 = vector.load %arg4[%c23, %c0_59] : memref<44x128xf32, #tpu.memory_space<vmem>>, vector<1x32xf32>
    %c24 = arith.constant 24 : index
    %c0_60 = arith.constant 0 : index
    %189 = vector.load %arg4[%c24, %c0_60] : memref<44x128xf32, #tpu.memory_space<vmem>>, vector<1x32xf32>
    %cst_61 = arith.constant dense<0.000000e+00> : vector<16xf32>
    %190 = vector.multi_reduction <add>, %187, %cst_61 [1] : vector<16x32xf32> to vector<16xf32>
    %191 = vector.shape_cast %190 : vector<16xf32> to vector<16x1xf32>
    %cst_62 = arith.constant 3.200000e+01 : f32
    %192 = vector.broadcast %cst_62 : f32 to vector<16x1xf32>
    %193 = arith.divf %191, %192 : vector<16x1xf32>
    %194 = arith.mulf %187, %187 : vector<16x32xf32>
    %cst_63 = arith.constant dense<0.000000e+00> : vector<16xf32>
    %195 = vector.multi_reduction <add>, %194, %cst_63 [1] : vector<16x32xf32> to vector<16xf32>
    %196 = vector.shape_cast %195 : vector<16xf32> to vector<16x1xf32>
    %cst_64 = arith.constant 3.200000e+01 : f32
    %197 = vector.broadcast %cst_64 : f32 to vector<16x1xf32>
    %198 = arith.divf %196, %197 : vector<16x1xf32>
    %199 = arith.mulf %193, %193 : vector<16x1xf32>
    %200 = arith.subf %198, %199 : vector<16x1xf32>
    %201 = vector.broadcast %193 : vector<16x1xf32> to vector<16x32xf32>
    %202 = arith.subf %187, %201 : vector<16x32xf32>
    %cst_65 = arith.constant 9.99999996E-13 : f32
    %203 = vector.broadcast %cst_65 : f32 to vector<16x1xf32>
    %204 = arith.addf %200, %203 : vector<16x1xf32>
    %205 = math.rsqrt %204 : vector<16x1xf32>
    %206 = vector.broadcast %205 : vector<16x1xf32> to vector<16x32xf32>
    %207 = arith.mulf %202, %206 : vector<16x32xf32>
    %208 = vector.broadcast %188 : vector<1x32xf32> to vector<16x32xf32>
    %209 = arith.mulf %207, %208 : vector<16x32xf32>
    %210 = vector.broadcast %189 : vector<1x32xf32> to vector<16x32xf32>
    %211 = arith.addf %209, %210 : vector<16x32xf32>
    %212 = tpu.iota {dimensions = array<i32: 0>} : vector<4x16xi32>
    %213 = tpu.iota {dimensions = array<i32: 1>} : vector<4x16xi32>
    %c39 = arith.constant 39 : index
    %c0_66 = arith.constant 0 : index
    %214 = vector.load %arg4[%c39, %c0_66] : memref<44x128xf32, #tpu.memory_space<vmem>>, vector<1x32xf32>
    %c4_i32 = arith.constant 4 : i32
    %215 = vector.broadcast %c4_i32 : i32 to vector<4x16xi32>
    %216 = arith.muli %215, %212 : vector<4x16xi32>
    %c0_i32_67 = arith.constant 0 : i32
    %217 = vector.broadcast %c0_i32_67 : i32 to vector<4x16xi32>
    %218 = arith.addi %216, %217 : vector<4x16xi32>
    %219 = arith.cmpi eq, %213, %218 : vector<4x16xi32>
    %220 = arith.extui %219 : vector<4x16xi1> to vector<4x16xi32>
    %221 = arith.sitofp %220 : vector<4x16xi32> to vector<4x16xf32>
    %cst_68 = arith.constant dense<0.000000e+00> : vector<4x32xf32>
    %222 = tpu.matmul %221, %211, %cst_68 {dimension_numbers = #tpu.dot_dimension_numbers<[1], [0], [0], [1], [0, 0, 1, 1], [], []>} : vector<4x16xf32>, vector<16x32xf32>, vector<4x32xf32> -> vector<4x32xf32>
    %c800 = arith.constant 800 : index
    %c0_69 = arith.constant 0 : index
    %223 = vector.load %arg3[%c800, %c0_69] : memref<992x128xf32, #tpu.memory_space<vmem>>, vector<32x32xf32>
    %cst_70 = arith.constant dense<0.000000e+00> : vector<4x32xf32>
    %224 = tpu.matmul %222, %223, %cst_70 {dimension_numbers = #tpu.dot_dimension_numbers<[1], [0], [0], [1], [0, 0, 1, 1], [], []>} : vector<4x32xf32>, vector<32x32xf32>, vector<4x32xf32> -> vector<4x32xf32>
    %225 = vector.broadcast %214 : vector<1x32xf32> to vector<4x32xf32>
    %226 = arith.addf %225, %224 : vector<4x32xf32>
    %c4_i32_71 = arith.constant 4 : i32
    %227 = vector.broadcast %c4_i32_71 : i32 to vector<4x16xi32>
    %228 = arith.muli %227, %212 : vector<4x16xi32>
    %c1_i32_72 = arith.constant 1 : i32
    %229 = vector.broadcast %c1_i32_72 : i32 to vector<4x16xi32>
    %230 = arith.addi %228, %229 : vector<4x16xi32>
    %231 = arith.cmpi eq, %213, %230 : vector<4x16xi32>
    %232 = arith.extui %231 : vector<4x16xi1> to vector<4x16xi32>
    %233 = arith.sitofp %232 : vector<4x16xi32> to vector<4x16xf32>
    %cst_73 = arith.constant dense<0.000000e+00> : vector<4x32xf32>
    %234 = tpu.matmul %233, %211, %cst_73 {dimension_numbers = #tpu.dot_dimension_numbers<[1], [0], [0], [1], [0, 0, 1, 1], [], []>} : vector<4x16xf32>, vector<16x32xf32>, vector<4x32xf32> -> vector<4x32xf32>
    %c832 = arith.constant 832 : index
    %c0_74 = arith.constant 0 : index
    %235 = vector.load %arg3[%c832, %c0_74] : memref<992x128xf32, #tpu.memory_space<vmem>>, vector<32x32xf32>
    %cst_75 = arith.constant dense<0.000000e+00> : vector<4x32xf32>
    %236 = tpu.matmul %234, %235, %cst_75 {dimension_numbers = #tpu.dot_dimension_numbers<[1], [0], [0], [1], [0, 0, 1, 1], [], []>} : vector<4x32xf32>, vector<32x32xf32>, vector<4x32xf32> -> vector<4x32xf32>
    %237 = arith.addf %226, %236 : vector<4x32xf32>
    %c4_i32_76 = arith.constant 4 : i32
    %238 = vector.broadcast %c4_i32_76 : i32 to vector<4x16xi32>
    %239 = arith.muli %238, %212 : vector<4x16xi32>
    %c2_i32 = arith.constant 2 : i32
    %240 = vector.broadcast %c2_i32 : i32 to vector<4x16xi32>
    %241 = arith.addi %239, %240 : vector<4x16xi32>
    %242 = arith.cmpi eq, %213, %241 : vector<4x16xi32>
    %243 = arith.extui %242 : vector<4x16xi1> to vector<4x16xi32>
    %244 = arith.sitofp %243 : vector<4x16xi32> to vector<4x16xf32>
    %cst_77 = arith.constant dense<0.000000e+00> : vector<4x32xf32>
    %245 = tpu.matmul %244, %211, %cst_77 {dimension_numbers = #tpu.dot_dimension_numbers<[1], [0], [0], [1], [0, 0, 1, 1], [], []>} : vector<4x16xf32>, vector<16x32xf32>, vector<4x32xf32> -> vector<4x32xf32>
    %c864 = arith.constant 864 : index
    %c0_78 = arith.constant 0 : index
    %246 = vector.load %arg3[%c864, %c0_78] : memref<992x128xf32, #tpu.memory_space<vmem>>, vector<32x32xf32>
    %cst_79 = arith.constant dense<0.000000e+00> : vector<4x32xf32>
    %247 = tpu.matmul %245, %246, %cst_79 {dimension_numbers = #tpu.dot_dimension_numbers<[1], [0], [0], [1], [0, 0, 1, 1], [], []>} : vector<4x32xf32>, vector<32x32xf32>, vector<4x32xf32> -> vector<4x32xf32>
    %248 = arith.addf %237, %247 : vector<4x32xf32>
    %c4_i32_80 = arith.constant 4 : i32
    %249 = vector.broadcast %c4_i32_80 : i32 to vector<4x16xi32>
    %250 = arith.muli %249, %212 : vector<4x16xi32>
    %c3_i32 = arith.constant 3 : i32
    %251 = vector.broadcast %c3_i32 : i32 to vector<4x16xi32>
    %252 = arith.addi %250, %251 : vector<4x16xi32>
    %253 = arith.cmpi eq, %213, %252 : vector<4x16xi32>
    %254 = arith.extui %253 : vector<4x16xi1> to vector<4x16xi32>
    %255 = arith.sitofp %254 : vector<4x16xi32> to vector<4x16xf32>
    %cst_81 = arith.constant dense<0.000000e+00> : vector<4x32xf32>
    %256 = tpu.matmul %255, %211, %cst_81 {dimension_numbers = #tpu.dot_dimension_numbers<[1], [0], [0], [1], [0, 0, 1, 1], [], []>} : vector<4x16xf32>, vector<16x32xf32>, vector<4x32xf32> -> vector<4x32xf32>
    %c896 = arith.constant 896 : index
    %c0_82 = arith.constant 0 : index
    %257 = vector.load %arg3[%c896, %c0_82] : memref<992x128xf32, #tpu.memory_space<vmem>>, vector<32x32xf32>
    %cst_83 = arith.constant dense<0.000000e+00> : vector<4x32xf32>
    %258 = tpu.matmul %256, %257, %cst_83 {dimension_numbers = #tpu.dot_dimension_numbers<[1], [0], [0], [1], [0, 0, 1, 1], [], []>} : vector<4x32xf32>, vector<32x32xf32>, vector<4x32xf32> -> vector<4x32xf32>
    %259 = arith.addf %248, %258 : vector<4x32xf32>
    %260 = arith.mulf %259, %259 : vector<4x32xf32>
    %261 = arith.mulf %259, %260 : vector<4x32xf32>
    %cst_84 = arith.constant 4.471500e-02 : f32
    %262 = vector.broadcast %cst_84 : f32 to vector<4x32xf32>
    %263 = arith.mulf %262, %261 : vector<4x32xf32>
    %264 = arith.addf %259, %263 : vector<4x32xf32>
    %cst_85 = arith.constant 0.797884583 : f32
    %265 = vector.broadcast %cst_85 : f32 to vector<4x32xf32>
    %266 = arith.mulf %265, %264 : vector<4x32xf32>
    %267 = math.tanh %266 : vector<4x32xf32>
    %cst_86 = arith.constant 1.000000e+00 : f32
    %268 = vector.broadcast %cst_86 : f32 to vector<4x32xf32>
    %269 = arith.addf %268, %267 : vector<4x32xf32>
    %cst_87 = arith.constant 5.000000e-01 : f32
    %270 = vector.broadcast %cst_87 : f32 to vector<4x32xf32>
    %271 = arith.mulf %270, %269 : vector<4x32xf32>
    %272 = arith.mulf %259, %271 : vector<4x32xf32>
    %c0_i32_88 = arith.constant 0 : i32
    %273 = vector.broadcast %c0_i32_88 : i32 to vector<4x16xi32>
    %274 = arith.cmpi eq, %212, %273 : vector<4x16xi32>
    %c0_i32_89 = arith.constant 0 : i32
    %275 = vector.broadcast %c0_i32_89 : i32 to vector<4x16xi32>
    %276 = arith.cmpi eq, %213, %275 : vector<4x16xi32>
    %277 = arith.andi %274, %276 : vector<4x16xi1>
    %278 = arith.extui %277 : vector<4x16xi1> to vector<4x16xi32>
    %279 = arith.sitofp %278 : vector<4x16xi32> to vector<4x16xf32>
    %280 = tpu.iota {dimensions = array<i32: 0>} : vector<4x4xi32>
    %281 = tpu.iota {dimensions = array<i32: 1>} : vector<4x4xi32>
    %c1_i32_90 = arith.constant 1 : i32
    %282 = vector.broadcast %c1_i32_90 : i32 to vector<4x4xi32>
    %283 = arith.addi %281, %282 : vector<4x4xi32>
    %284 = arith.cmpi eq, %280, %283 : vector<4x4xi32>
    %285 = arith.extui %284 : vector<4x4xi1> to vector<4x4xi32>
    %286 = arith.sitofp %285 : vector<4x4xi32> to vector<4x4xf32>
    %cst_91 = arith.constant dense<0.000000e+00> : vector<4x32xf32>
    %287 = tpu.matmul %279, %211, %cst_91 {dimension_numbers = #tpu.dot_dimension_numbers<[1], [0], [0], [1], [0, 0, 1, 1], [], []>} : vector<4x16xf32>, vector<16x32xf32>, vector<4x32xf32> -> vector<4x32xf32>
    %cst_92 = arith.constant dense<0.000000e+00> : vector<4x32xf32>
    %288 = tpu.matmul %286, %272, %cst_92 {dimension_numbers = #tpu.dot_dimension_numbers<[1], [0], [0], [1], [0, 0, 1, 1], [], []>} : vector<4x4xf32>, vector<4x32xf32>, vector<4x32xf32> -> vector<4x32xf32>
    %289 = arith.addf %287, %288 : vector<4x32xf32>
    %c40 = arith.constant 40 : index
    %c0_93 = arith.constant 0 : index
    %290 = vector.load %arg4[%c40, %c0_93] : memref<44x128xf32, #tpu.memory_space<vmem>>, vector<1x32xf32>
    %c41 = arith.constant 41 : index
    %c0_94 = arith.constant 0 : index
    %291 = vector.load %arg4[%c41, %c0_94] : memref<44x128xf32, #tpu.memory_space<vmem>>, vector<1x32xf32>
    %cst_95 = arith.constant dense<0.000000e+00> : vector<4xf32>
    %292 = vector.multi_reduction <add>, %289, %cst_95 [1] : vector<4x32xf32> to vector<4xf32>
    %293 = vector.shape_cast %292 : vector<4xf32> to vector<4x1xf32>
    %cst_96 = arith.constant 3.200000e+01 : f32
    %294 = vector.broadcast %cst_96 : f32 to vector<4x1xf32>
    %295 = arith.divf %293, %294 : vector<4x1xf32>
    %296 = arith.mulf %289, %289 : vector<4x32xf32>
    %cst_97 = arith.constant dense<0.000000e+00> : vector<4xf32>
    %297 = vector.multi_reduction <add>, %296, %cst_97 [1] : vector<4x32xf32> to vector<4xf32>
    %298 = vector.shape_cast %297 : vector<4xf32> to vector<4x1xf32>
    %cst_98 = arith.constant 3.200000e+01 : f32
    %299 = vector.broadcast %cst_98 : f32 to vector<4x1xf32>
    %300 = arith.divf %298, %299 : vector<4x1xf32>
    %301 = arith.mulf %295, %295 : vector<4x1xf32>
    %302 = arith.subf %300, %301 : vector<4x1xf32>
    %303 = vector.broadcast %295 : vector<4x1xf32> to vector<4x32xf32>
    %304 = arith.subf %289, %303 : vector<4x32xf32>
    %cst_99 = arith.constant 9.99999996E-13 : f32
    %305 = vector.broadcast %cst_99 : f32 to vector<4x1xf32>
    %306 = arith.addf %302, %305 : vector<4x1xf32>
    %307 = math.rsqrt %306 : vector<4x1xf32>
    %308 = vector.broadcast %307 : vector<4x1xf32> to vector<4x32xf32>
    %309 = arith.mulf %304, %308 : vector<4x32xf32>
    %310 = vector.broadcast %290 : vector<1x32xf32> to vector<4x32xf32>
    %311 = arith.mulf %309, %310 : vector<4x32xf32>
    %312 = vector.broadcast %291 : vector<1x32xf32> to vector<4x32xf32>
    %313 = arith.addf %311, %312 : vector<4x32xf32>
    %c25 = arith.constant 25 : index
    %c0_100 = arith.constant 0 : index
    %314 = vector.load %arg4[%c25, %c0_100] : memref<44x128xf32, #tpu.memory_space<vmem>>, vector<1x32xf32>
    %c352 = arith.constant 352 : index
    %c0_101 = arith.constant 0 : index
    %315 = vector.load %arg3[%c352, %c0_101] : memref<992x128xf32, #tpu.memory_space<vmem>>, vector<32x32xf32>
    %c416 = arith.constant 416 : index
    %c0_102 = arith.constant 0 : index
    %316 = vector.load %arg3[%c416, %c0_102] : memref<992x128xf32, #tpu.memory_space<vmem>>, vector<32x32xf32>
    %cst_103 = arith.constant dense<0.000000e+00> : vector<4x32xf32>
    %317 = tpu.matmul %313, %315, %cst_103 {dimension_numbers = #tpu.dot_dimension_numbers<[1], [0], [0], [1], [0, 0, 1, 1], [], []>} : vector<4x32xf32>, vector<32x32xf32>, vector<4x32xf32> -> vector<4x32xf32>
    "tpu.trace_start"() <{level = 10 : i32, message = "qd,kd->qk"}> : () -> ()
    %cst_104 = arith.constant dense<0.000000e+00> : vector<4x4xf32>
    %318 = tpu.matmul %317, %313, %cst_104 {dimension_numbers = #tpu.dot_dimension_numbers<[1], [1], [0], [0], [0, 0, 1, 0], [], []>} : vector<4x32xf32>, vector<4x32xf32>, vector<4x4xf32> -> vector<4x4xf32>
    "tpu.trace_stop"() : () -> ()
    %cst_105 = arith.constant 2.500000e-01 : f32
    %319 = vector.broadcast %cst_105 : f32 to vector<4x4xf32>
    %320 = arith.mulf %318, %319 : vector<4x4xf32>
    %321 = vector.broadcast %5 : vector<1x4xf32> to vector<4x4xf32>
    %322 = arith.addf %320, %321 : vector<4x4xf32>
    %323 = math.exp %322 : vector<4x4xf32>
    %cst_106 = arith.constant dense<0.000000e+00> : vector<4xf32>
    %324 = vector.multi_reduction <add>, %323, %cst_106 [1] : vector<4x4xf32> to vector<4xf32>
    %325 = vector.shape_cast %324 : vector<4xf32> to vector<4x1xf32>
    %326 = tpu.reciprocal %325 {approx = true} : vector<4x1xf32> -> vector<4x1xf32>
    %327 = vector.broadcast %326 : vector<4x1xf32> to vector<4x4xf32>
    %328 = arith.mulf %323, %327 : vector<4x4xf32>
    %cst_107 = arith.constant dense<0.000000e+00> : vector<4x32xf32>
    %329 = tpu.matmul %328, %313, %cst_107 {dimension_numbers = #tpu.dot_dimension_numbers<[1], [0], [0], [1], [0, 0, 1, 1], [], []>} : vector<4x4xf32>, vector<4x32xf32>, vector<4x32xf32> -> vector<4x32xf32>
    %cst_108 = arith.constant dense<0.000000e+00> : vector<4x32xf32>
    %330 = tpu.matmul %329, %316, %cst_108 {dimension_numbers = #tpu.dot_dimension_numbers<[1], [0], [0], [1], [0, 0, 1, 1], [], []>} : vector<4x32xf32>, vector<32x32xf32>, vector<4x32xf32> -> vector<4x32xf32>
    %331 = vector.broadcast %314 : vector<1x32xf32> to vector<4x32xf32>
    %332 = arith.addf %331, %330 : vector<4x32xf32>
    %c384 = arith.constant 384 : index
    %c0_109 = arith.constant 0 : index
    %333 = vector.load %arg3[%c384, %c0_109] : memref<992x128xf32, #tpu.memory_space<vmem>>, vector<32x32xf32>
    %c448 = arith.constant 448 : index
    %c0_110 = arith.constant 0 : index
    %334 = vector.load %arg3[%c448, %c0_110] : memref<992x128xf32, #tpu.memory_space<vmem>>, vector<32x32xf32>
    %cst_111 = arith.constant dense<0.000000e+00> : vector<4x32xf32>
    %335 = tpu.matmul %313, %333, %cst_111 {dimension_numbers = #tpu.dot_dimension_numbers<[1], [0], [0], [1], [0, 0, 1, 1], [], []>} : vector<4x32xf32>, vector<32x32xf32>, vector<4x32xf32> -> vector<4x32xf32>
    "tpu.trace_start"() <{level = 10 : i32, message = "qd,kd->qk"}> : () -> ()
    %cst_112 = arith.constant dense<0.000000e+00> : vector<4x4xf32>
    %336 = tpu.matmul %335, %313, %cst_112 {dimension_numbers = #tpu.dot_dimension_numbers<[1], [1], [0], [0], [0, 0, 1, 0], [], []>} : vector<4x32xf32>, vector<4x32xf32>, vector<4x4xf32> -> vector<4x4xf32>
    "tpu.trace_stop"() : () -> ()
    %cst_113 = arith.constant 2.500000e-01 : f32
    %337 = vector.broadcast %cst_113 : f32 to vector<4x4xf32>
    %338 = arith.mulf %336, %337 : vector<4x4xf32>
    %339 = vector.broadcast %5 : vector<1x4xf32> to vector<4x4xf32>
    %340 = arith.addf %338, %339 : vector<4x4xf32>
    %341 = math.exp %340 : vector<4x4xf32>
    %cst_114 = arith.constant dense<0.000000e+00> : vector<4xf32>
    %342 = vector.multi_reduction <add>, %341, %cst_114 [1] : vector<4x4xf32> to vector<4xf32>
    %343 = vector.shape_cast %342 : vector<4xf32> to vector<4x1xf32>
    %344 = tpu.reciprocal %343 {approx = true} : vector<4x1xf32> -> vector<4x1xf32>
    %345 = vector.broadcast %344 : vector<4x1xf32> to vector<4x4xf32>
    %346 = arith.mulf %341, %345 : vector<4x4xf32>
    %cst_115 = arith.constant dense<0.000000e+00> : vector<4x32xf32>
    %347 = tpu.matmul %346, %313, %cst_115 {dimension_numbers = #tpu.dot_dimension_numbers<[1], [0], [0], [1], [0, 0, 1, 1], [], []>} : vector<4x4xf32>, vector<4x32xf32>, vector<4x32xf32> -> vector<4x32xf32>
    %cst_116 = arith.constant dense<0.000000e+00> : vector<4x32xf32>
    %348 = tpu.matmul %347, %334, %cst_116 {dimension_numbers = #tpu.dot_dimension_numbers<[1], [0], [0], [1], [0, 0, 1, 1], [], []>} : vector<4x32xf32>, vector<32x32xf32>, vector<4x32xf32> -> vector<4x32xf32>
    %349 = arith.addf %332, %348 : vector<4x32xf32>
    %350 = arith.addf %313, %349 : vector<4x32xf32>
    %c26 = arith.constant 26 : index
    %c0_117 = arith.constant 0 : index
    %351 = vector.load %arg4[%c26, %c0_117] : memref<44x128xf32, #tpu.memory_space<vmem>>, vector<1x32xf32>
    %c27 = arith.constant 27 : index
    %c0_118 = arith.constant 0 : index
    %352 = vector.load %arg4[%c27, %c0_118] : memref<44x128xf32, #tpu.memory_space<vmem>>, vector<1x32xf32>
    %cst_119 = arith.constant dense<0.000000e+00> : vector<4xf32>
    %353 = vector.multi_reduction <add>, %350, %cst_119 [1] : vector<4x32xf32> to vector<4xf32>
    %354 = vector.shape_cast %353 : vector<4xf32> to vector<4x1xf32>
    %cst_120 = arith.constant 3.200000e+01 : f32
    %355 = vector.broadcast %cst_120 : f32 to vector<4x1xf32>
    %356 = arith.divf %354, %355 : vector<4x1xf32>
    %357 = arith.mulf %350, %350 : vector<4x32xf32>
    %cst_121 = arith.constant dense<0.000000e+00> : vector<4xf32>
    %358 = vector.multi_reduction <add>, %357, %cst_121 [1] : vector<4x32xf32> to vector<4xf32>
    %359 = vector.shape_cast %358 : vector<4xf32> to vector<4x1xf32>
    %cst_122 = arith.constant 3.200000e+01 : f32
    %360 = vector.broadcast %cst_122 : f32 to vector<4x1xf32>
    %361 = arith.divf %359, %360 : vector<4x1xf32>
    %362 = arith.mulf %356, %356 : vector<4x1xf32>
    %363 = arith.subf %361, %362 : vector<4x1xf32>
    %364 = vector.broadcast %356 : vector<4x1xf32> to vector<4x32xf32>
    %365 = arith.subf %350, %364 : vector<4x32xf32>
    %cst_123 = arith.constant 9.99999996E-13 : f32
    %366 = vector.broadcast %cst_123 : f32 to vector<4x1xf32>
    %367 = arith.addf %363, %366 : vector<4x1xf32>
    %368 = math.rsqrt %367 : vector<4x1xf32>
    %369 = vector.broadcast %368 : vector<4x1xf32> to vector<4x32xf32>
    %370 = arith.mulf %365, %369 : vector<4x32xf32>
    %371 = vector.broadcast %351 : vector<1x32xf32> to vector<4x32xf32>
    %372 = arith.mulf %370, %371 : vector<4x32xf32>
    %373 = vector.broadcast %352 : vector<1x32xf32> to vector<4x32xf32>
    %374 = arith.addf %372, %373 : vector<4x32xf32>
    %c480 = arith.constant 480 : index
    %c0_124 = arith.constant 0 : index
    %375 = vector.load %arg3[%c480, %c0_124] : memref<992x128xf32, #tpu.memory_space<vmem>>, vector<32x64xf32>
    %c28 = arith.constant 28 : index
    %c0_125 = arith.constant 0 : index
    %376 = vector.load %arg4[%c28, %c0_125] : memref<44x128xf32, #tpu.memory_space<vmem>>, vector<1x64xf32>
    %c512 = arith.constant 512 : index
    %c0_126 = arith.constant 0 : index
    %377 = vector.load %arg3[%c512, %c0_126] : memref<992x128xf32, #tpu.memory_space<vmem>>, vector<64x32xf32>
    %c29 = arith.constant 29 : index
    %c0_127 = arith.constant 0 : index
    %378 = vector.load %arg4[%c29, %c0_127] : memref<44x128xf32, #tpu.memory_space<vmem>>, vector<1x32xf32>
    %cst_128 = arith.constant dense<0.000000e+00> : vector<4x64xf32>
    %379 = tpu.matmul %374, %375, %cst_128 {dimension_numbers = #tpu.dot_dimension_numbers<[1], [0], [0], [1], [0, 0, 1, 1], [], []>} : vector<4x32xf32>, vector<32x64xf32>, vector<4x64xf32> -> vector<4x64xf32>
    %380 = vector.broadcast %376 : vector<1x64xf32> to vector<4x64xf32>
    %381 = arith.addf %379, %380 : vector<4x64xf32>
    %382 = arith.mulf %381, %381 : vector<4x64xf32>
    %383 = arith.mulf %381, %382 : vector<4x64xf32>
    %cst_129 = arith.constant 4.471500e-02 : f32
    %384 = vector.broadcast %cst_129 : f32 to vector<4x64xf32>
    %385 = arith.mulf %384, %383 : vector<4x64xf32>
    %386 = arith.addf %381, %385 : vector<4x64xf32>
    %cst_130 = arith.constant 0.797884583 : f32
    %387 = vector.broadcast %cst_130 : f32 to vector<4x64xf32>
    %388 = arith.mulf %387, %386 : vector<4x64xf32>
    %389 = math.tanh %388 : vector<4x64xf32>
    %cst_131 = arith.constant 1.000000e+00 : f32
    %390 = vector.broadcast %cst_131 : f32 to vector<4x64xf32>
    %391 = arith.addf %390, %389 : vector<4x64xf32>
    %cst_132 = arith.constant 5.000000e-01 : f32
    %392 = vector.broadcast %cst_132 : f32 to vector<4x64xf32>
    %393 = arith.mulf %392, %391 : vector<4x64xf32>
    %394 = arith.mulf %381, %393 : vector<4x64xf32>
    %cst_133 = arith.constant dense<0.000000e+00> : vector<4x32xf32>
    %395 = tpu.matmul %394, %377, %cst_133 {dimension_numbers = #tpu.dot_dimension_numbers<[1], [0], [0], [1], [0, 0, 1, 1], [], []>} : vector<4x64xf32>, vector<64x32xf32>, vector<4x32xf32> -> vector<4x32xf32>
    %396 = vector.broadcast %378 : vector<1x32xf32> to vector<4x32xf32>
    %397 = arith.addf %395, %396 : vector<4x32xf32>
    %398 = arith.addf %374, %397 : vector<4x32xf32>
    %c30 = arith.constant 30 : index
    %c0_134 = arith.constant 0 : index
    %399 = vector.load %arg4[%c30, %c0_134] : memref<44x128xf32, #tpu.memory_space<vmem>>, vector<1x32xf32>
    %c31 = arith.constant 31 : index
    %c0_135 = arith.constant 0 : index
    %400 = vector.load %arg4[%c31, %c0_135] : memref<44x128xf32, #tpu.memory_space<vmem>>, vector<1x32xf32>
    %cst_136 = arith.constant dense<0.000000e+00> : vector<4xf32>
    %401 = vector.multi_reduction <add>, %398, %cst_136 [1] : vector<4x32xf32> to vector<4xf32>
    %402 = vector.shape_cast %401 : vector<4xf32> to vector<4x1xf32>
    %cst_137 = arith.constant 3.200000e+01 : f32
    %403 = vector.broadcast %cst_137 : f32 to vector<4x1xf32>
    %404 = arith.divf %402, %403 : vector<4x1xf32>
    %405 = arith.mulf %398, %398 : vector<4x32xf32>
    %cst_138 = arith.constant dense<0.000000e+00> : vector<4xf32>
    %406 = vector.multi_reduction <add>, %405, %cst_138 [1] : vector<4x32xf32> to vector<4xf32>
    %407 = vector.shape_cast %406 : vector<4xf32> to vector<4x1xf32>
    %cst_139 = arith.constant 3.200000e+01 : f32
    %408 = vector.broadcast %cst_139 : f32 to vector<4x1xf32>
    %409 = arith.divf %407, %408 : vector<4x1xf32>
    %410 = arith.mulf %404, %404 : vector<4x1xf32>
    %411 = arith.subf %409, %410 : vector<4x1xf32>
    %412 = vector.broadcast %404 : vector<4x1xf32> to vector<4x32xf32>
    %413 = arith.subf %398, %412 : vector<4x32xf32>
    %cst_140 = arith.constant 9.99999996E-13 : f32
    %414 = vector.broadcast %cst_140 : f32 to vector<4x1xf32>
    %415 = arith.addf %411, %414 : vector<4x1xf32>
    %416 = math.rsqrt %415 : vector<4x1xf32>
    %417 = vector.broadcast %416 : vector<4x1xf32> to vector<4x32xf32>
    %418 = arith.mulf %413, %417 : vector<4x32xf32>
    %419 = vector.broadcast %399 : vector<1x32xf32> to vector<4x32xf32>
    %420 = arith.mulf %418, %419 : vector<4x32xf32>
    %421 = vector.broadcast %400 : vector<1x32xf32> to vector<4x32xf32>
    %422 = arith.addf %420, %421 : vector<4x32xf32>
    %c32 = arith.constant 32 : index
    %c0_141 = arith.constant 0 : index
    %423 = vector.load %arg4[%c32, %c0_141] : memref<44x128xf32, #tpu.memory_space<vmem>>, vector<1x32xf32>
    %c576 = arith.constant 576 : index
    %c0_142 = arith.constant 0 : index
    %424 = vector.load %arg3[%c576, %c0_142] : memref<992x128xf32, #tpu.memory_space<vmem>>, vector<32x32xf32>
    %c640 = arith.constant 640 : index
    %c0_143 = arith.constant 0 : index
    %425 = vector.load %arg3[%c640, %c0_143] : memref<992x128xf32, #tpu.memory_space<vmem>>, vector<32x32xf32>
    %cst_144 = arith.constant dense<0.000000e+00> : vector<4x32xf32>
    %426 = tpu.matmul %422, %424, %cst_144 {dimension_numbers = #tpu.dot_dimension_numbers<[1], [0], [0], [1], [0, 0, 1, 1], [], []>} : vector<4x32xf32>, vector<32x32xf32>, vector<4x32xf32> -> vector<4x32xf32>
    "tpu.trace_start"() <{level = 10 : i32, message = "qd,kd->qk"}> : () -> ()
    %cst_145 = arith.constant dense<0.000000e+00> : vector<4x4xf32>
    %427 = tpu.matmul %426, %422, %cst_145 {dimension_numbers = #tpu.dot_dimension_numbers<[1], [1], [0], [0], [0, 0, 1, 0], [], []>} : vector<4x32xf32>, vector<4x32xf32>, vector<4x4xf32> -> vector<4x4xf32>
    "tpu.trace_stop"() : () -> ()
    %cst_146 = arith.constant 2.500000e-01 : f32
    %428 = vector.broadcast %cst_146 : f32 to vector<4x4xf32>
    %429 = arith.mulf %427, %428 : vector<4x4xf32>
    %430 = vector.broadcast %5 : vector<1x4xf32> to vector<4x4xf32>
    %431 = arith.addf %429, %430 : vector<4x4xf32>
    %432 = math.exp %431 : vector<4x4xf32>
    %cst_147 = arith.constant dense<0.000000e+00> : vector<4xf32>
    %433 = vector.multi_reduction <add>, %432, %cst_147 [1] : vector<4x4xf32> to vector<4xf32>
    %434 = vector.shape_cast %433 : vector<4xf32> to vector<4x1xf32>
    %435 = tpu.reciprocal %434 {approx = true} : vector<4x1xf32> -> vector<4x1xf32>
    %436 = vector.broadcast %435 : vector<4x1xf32> to vector<4x4xf32>
    %437 = arith.mulf %432, %436 : vector<4x4xf32>
    %cst_148 = arith.constant dense<0.000000e+00> : vector<4x32xf32>
    %438 = tpu.matmul %437, %422, %cst_148 {dimension_numbers = #tpu.dot_dimension_numbers<[1], [0], [0], [1], [0, 0, 1, 1], [], []>} : vector<4x4xf32>, vector<4x32xf32>, vector<4x32xf32> -> vector<4x32xf32>
    %cst_149 = arith.constant dense<0.000000e+00> : vector<4x32xf32>
    %439 = tpu.matmul %438, %425, %cst_149 {dimension_numbers = #tpu.dot_dimension_numbers<[1], [0], [0], [1], [0, 0, 1, 1], [], []>} : vector<4x32xf32>, vector<32x32xf32>, vector<4x32xf32> -> vector<4x32xf32>
    %440 = vector.broadcast %423 : vector<1x32xf32> to vector<4x32xf32>
    %441 = arith.addf %440, %439 : vector<4x32xf32>
    %c608 = arith.constant 608 : index
    %c0_150 = arith.constant 0 : index
    %442 = vector.load %arg3[%c608, %c0_150] : memref<992x128xf32, #tpu.memory_space<vmem>>, vector<32x32xf32>
    %c672 = arith.constant 672 : index
    %c0_151 = arith.constant 0 : index
    %443 = vector.load %arg3[%c672, %c0_151] : memref<992x128xf32, #tpu.memory_space<vmem>>, vector<32x32xf32>
    %cst_152 = arith.constant dense<0.000000e+00> : vector<4x32xf32>
    %444 = tpu.matmul %422, %442, %cst_152 {dimension_numbers = #tpu.dot_dimension_numbers<[1], [0], [0], [1], [0, 0, 1, 1], [], []>} : vector<4x32xf32>, vector<32x32xf32>, vector<4x32xf32> -> vector<4x32xf32>
    "tpu.trace_start"() <{level = 10 : i32, message = "qd,kd->qk"}> : () -> ()
    %cst_153 = arith.constant dense<0.000000e+00> : vector<4x4xf32>
    %445 = tpu.matmul %444, %422, %cst_153 {dimension_numbers = #tpu.dot_dimension_numbers<[1], [1], [0], [0], [0, 0, 1, 0], [], []>} : vector<4x32xf32>, vector<4x32xf32>, vector<4x4xf32> -> vector<4x4xf32>
    "tpu.trace_stop"() : () -> ()
    %cst_154 = arith.constant 2.500000e-01 : f32
    %446 = vector.broadcast %cst_154 : f32 to vector<4x4xf32>
    %447 = arith.mulf %445, %446 : vector<4x4xf32>
    %448 = vector.broadcast %5 : vector<1x4xf32> to vector<4x4xf32>
    %449 = arith.addf %447, %448 : vector<4x4xf32>
    %450 = math.exp %449 : vector<4x4xf32>
    %cst_155 = arith.constant dense<0.000000e+00> : vector<4xf32>
    %451 = vector.multi_reduction <add>, %450, %cst_155 [1] : vector<4x4xf32> to vector<4xf32>
    %452 = vector.shape_cast %451 : vector<4xf32> to vector<4x1xf32>
    %453 = tpu.reciprocal %452 {approx = true} : vector<4x1xf32> -> vector<4x1xf32>
    %454 = vector.broadcast %453 : vector<4x1xf32> to vector<4x4xf32>
    %455 = arith.mulf %450, %454 : vector<4x4xf32>
    %cst_156 = arith.constant dense<0.000000e+00> : vector<4x32xf32>
    %456 = tpu.matmul %455, %422, %cst_156 {dimension_numbers = #tpu.dot_dimension_numbers<[1], [0], [0], [1], [0, 0, 1, 1], [], []>} : vector<4x4xf32>, vector<4x32xf32>, vector<4x32xf32> -> vector<4x32xf32>
    %cst_157 = arith.constant dense<0.000000e+00> : vector<4x32xf32>
    %457 = tpu.matmul %456, %443, %cst_157 {dimension_numbers = #tpu.dot_dimension_numbers<[1], [0], [0], [1], [0, 0, 1, 1], [], []>} : vector<4x32xf32>, vector<32x32xf32>, vector<4x32xf32> -> vector<4x32xf32>
    %458 = arith.addf %441, %457 : vector<4x32xf32>
    %459 = arith.addf %422, %458 : vector<4x32xf32>
    %c33 = arith.constant 33 : index
    %c0_158 = arith.constant 0 : index
    %460 = vector.load %arg4[%c33, %c0_158] : memref<44x128xf32, #tpu.memory_space<vmem>>, vector<1x32xf32>
    %c34 = arith.constant 34 : index
    %c0_159 = arith.constant 0 : index
    %461 = vector.load %arg4[%c34, %c0_159] : memref<44x128xf32, #tpu.memory_space<vmem>>, vector<1x32xf32>
    %cst_160 = arith.constant dense<0.000000e+00> : vector<4xf32>
    %462 = vector.multi_reduction <add>, %459, %cst_160 [1] : vector<4x32xf32> to vector<4xf32>
    %463 = vector.shape_cast %462 : vector<4xf32> to vector<4x1xf32>
    %cst_161 = arith.constant 3.200000e+01 : f32
    %464 = vector.broadcast %cst_161 : f32 to vector<4x1xf32>
    %465 = arith.divf %463, %464 : vector<4x1xf32>
    %466 = arith.mulf %459, %459 : vector<4x32xf32>
    %cst_162 = arith.constant dense<0.000000e+00> : vector<4xf32>
    %467 = vector.multi_reduction <add>, %466, %cst_162 [1] : vector<4x32xf32> to vector<4xf32>
    %468 = vector.shape_cast %467 : vector<4xf32> to vector<4x1xf32>
    %cst_163 = arith.constant 3.200000e+01 : f32
    %469 = vector.broadcast %cst_163 : f32 to vector<4x1xf32>
    %470 = arith.divf %468, %469 : vector<4x1xf32>
    %471 = arith.mulf %465, %465 : vector<4x1xf32>
    %472 = arith.subf %470, %471 : vector<4x1xf32>
    %473 = vector.broadcast %465 : vector<4x1xf32> to vector<4x32xf32>
    %474 = arith.subf %459, %473 : vector<4x32xf32>
    %cst_164 = arith.constant 9.99999996E-13 : f32
    %475 = vector.broadcast %cst_164 : f32 to vector<4x1xf32>
    %476 = arith.addf %472, %475 : vector<4x1xf32>
    %477 = math.rsqrt %476 : vector<4x1xf32>
    %478 = vector.broadcast %477 : vector<4x1xf32> to vector<4x32xf32>
    %479 = arith.mulf %474, %478 : vector<4x32xf32>
    %480 = vector.broadcast %460 : vector<1x32xf32> to vector<4x32xf32>
    %481 = arith.mulf %479, %480 : vector<4x32xf32>
    %482 = vector.broadcast %461 : vector<1x32xf32> to vector<4x32xf32>
    %483 = arith.addf %481, %482 : vector<4x32xf32>
    %c704 = arith.constant 704 : index
    %c0_165 = arith.constant 0 : index
    %484 = vector.load %arg3[%c704, %c0_165] : memref<992x128xf32, #tpu.memory_space<vmem>>, vector<32x64xf32>
    %c35 = arith.constant 35 : index
    %c0_166 = arith.constant 0 : index
    %485 = vector.load %arg4[%c35, %c0_166] : memref<44x128xf32, #tpu.memory_space<vmem>>, vector<1x64xf32>
    %c736 = arith.constant 736 : index
    %c0_167 = arith.constant 0 : index
    %486 = vector.load %arg3[%c736, %c0_167] : memref<992x128xf32, #tpu.memory_space<vmem>>, vector<64x32xf32>
    %c36 = arith.constant 36 : index
    %c0_168 = arith.constant 0 : index
    %487 = vector.load %arg4[%c36, %c0_168] : memref<44x128xf32, #tpu.memory_space<vmem>>, vector<1x32xf32>
    %cst_169 = arith.constant dense<0.000000e+00> : vector<4x64xf32>
    %488 = tpu.matmul %483, %484, %cst_169 {dimension_numbers = #tpu.dot_dimension_numbers<[1], [0], [0], [1], [0, 0, 1, 1], [], []>} : vector<4x32xf32>, vector<32x64xf32>, vector<4x64xf32> -> vector<4x64xf32>
    %489 = vector.broadcast %485 : vector<1x64xf32> to vector<4x64xf32>
    %490 = arith.addf %488, %489 : vector<4x64xf32>
    %491 = arith.mulf %490, %490 : vector<4x64xf32>
    %492 = arith.mulf %490, %491 : vector<4x64xf32>
    %cst_170 = arith.constant 4.471500e-02 : f32
    %493 = vector.broadcast %cst_170 : f32 to vector<4x64xf32>
    %494 = arith.mulf %493, %492 : vector<4x64xf32>
    %495 = arith.addf %490, %494 : vector<4x64xf32>
    %cst_171 = arith.constant 0.797884583 : f32
    %496 = vector.broadcast %cst_171 : f32 to vector<4x64xf32>
    %497 = arith.mulf %496, %495 : vector<4x64xf32>
    %498 = math.tanh %497 : vector<4x64xf32>
    %cst_172 = arith.constant 1.000000e+00 : f32
    %499 = vector.broadcast %cst_172 : f32 to vector<4x64xf32>
    %500 = arith.addf %499, %498 : vector<4x64xf32>
    %cst_173 = arith.constant 5.000000e-01 : f32
    %501 = vector.broadcast %cst_173 : f32 to vector<4x64xf32>
    %502 = arith.mulf %501, %500 : vector<4x64xf32>
    %503 = arith.mulf %490, %502 : vector<4x64xf32>
    %cst_174 = arith.constant dense<0.000000e+00> : vector<4x32xf32>
    %504 = tpu.matmul %503, %486, %cst_174 {dimension_numbers = #tpu.dot_dimension_numbers<[1], [0], [0], [1], [0, 0, 1, 1], [], []>} : vector<4x64xf32>, vector<64x32xf32>, vector<4x32xf32> -> vector<4x32xf32>
    %505 = vector.broadcast %487 : vector<1x32xf32> to vector<4x32xf32>
    %506 = arith.addf %504, %505 : vector<4x32xf32>
    %507 = arith.addf %483, %506 : vector<4x32xf32>
    %c37 = arith.constant 37 : index
    %c0_175 = arith.constant 0 : index
    %508 = vector.load %arg4[%c37, %c0_175] : memref<44x128xf32, #tpu.memory_space<vmem>>, vector<1x32xf32>
    %c38 = arith.constant 38 : index
    %c0_176 = arith.constant 0 : index
    %509 = vector.load %arg4[%c38, %c0_176] : memref<44x128xf32, #tpu.memory_space<vmem>>, vector<1x32xf32>
    %cst_177 = arith.constant dense<0.000000e+00> : vector<4xf32>
    %510 = vector.multi_reduction <add>, %507, %cst_177 [1] : vector<4x32xf32> to vector<4xf32>
    %511 = vector.shape_cast %510 : vector<4xf32> to vector<4x1xf32>
    %cst_178 = arith.constant 3.200000e+01 : f32
    %512 = vector.broadcast %cst_178 : f32 to vector<4x1xf32>
    %513 = arith.divf %511, %512 : vector<4x1xf32>
    %514 = arith.mulf %507, %507 : vector<4x32xf32>
    %cst_179 = arith.constant dense<0.000000e+00> : vector<4xf32>
    %515 = vector.multi_reduction <add>, %514, %cst_179 [1] : vector<4x32xf32> to vector<4xf32>
    %516 = vector.shape_cast %515 : vector<4xf32> to vector<4x1xf32>
    %cst_180 = arith.constant 3.200000e+01 : f32
    %517 = vector.broadcast %cst_180 : f32 to vector<4x1xf32>
    %518 = arith.divf %516, %517 : vector<4x1xf32>
    %519 = arith.mulf %513, %513 : vector<4x1xf32>
    %520 = arith.subf %518, %519 : vector<4x1xf32>
    %521 = vector.broadcast %513 : vector<4x1xf32> to vector<4x32xf32>
    %522 = arith.subf %507, %521 : vector<4x32xf32>
    %cst_181 = arith.constant 9.99999996E-13 : f32
    %523 = vector.broadcast %cst_181 : f32 to vector<4x1xf32>
    %524 = arith.addf %520, %523 : vector<4x1xf32>
    %525 = math.rsqrt %524 : vector<4x1xf32>
    %526 = vector.broadcast %525 : vector<4x1xf32> to vector<4x32xf32>
    %527 = arith.mulf %522, %526 : vector<4x32xf32>
    %528 = vector.broadcast %508 : vector<1x32xf32> to vector<4x32xf32>
    %529 = arith.mulf %527, %528 : vector<4x32xf32>
    %530 = vector.broadcast %509 : vector<1x32xf32> to vector<4x32xf32>
    %531 = arith.addf %529, %530 : vector<4x32xf32>
    %532 = vector.extract_strided_slice %531 {offsets = [0, 0], sizes = [1, 32], strides = [1, 1]} : vector<4x32xf32> to vector<1x32xf32>
    %c928 = arith.constant 928 : index
    %c0_182 = arith.constant 0 : index
    %533 = vector.load %arg3[%c928, %c0_182] : memref<992x128xf32, #tpu.memory_space<vmem>>, vector<32x32xf32>
    %cst_183 = arith.constant dense<0.000000e+00> : vector<1x32xf32>
    %534 = tpu.matmul %532, %533, %cst_183 {dimension_numbers = #tpu.dot_dimension_numbers<[1], [0], [0], [1], [0, 0, 1, 1], [], []>} : vector<1x32xf32>, vector<32x32xf32>, vector<1x32xf32> -> vector<1x32xf32>
    %c42 = arith.constant 42 : index
    %c0_184 = arith.constant 0 : index
    %535 = vector.load %arg4[%c42, %c0_184] : memref<44x128xf32, #tpu.memory_space<vmem>>, vector<1x32xf32>
    %536 = arith.addf %534, %535 : vector<1x32xf32>
    %537 = math.tanh %536 : vector<1x32xf32>
    %c960 = arith.constant 960 : index
    %c0_185 = arith.constant 0 : index
    %538 = vector.load %arg3[%c960, %c0_185] : memref<992x128xf32, #tpu.memory_space<vmem>>, vector<32x128xf32>
    %cst_186 = arith.constant dense<0.000000e+00> : vector<1x128xf32>
    %539 = tpu.matmul %537, %538, %cst_186 {dimension_numbers = #tpu.dot_dimension_numbers<[1], [0], [0], [1], [0, 0, 1, 1], [], []>} : vector<1x32xf32>, vector<32x128xf32>, vector<1x128xf32> -> vector<1x128xf32>
    %c43 = arith.constant 43 : index
    %c0_187 = arith.constant 0 : index
    %540 = vector.load %arg4[%c43, %c0_187] : memref<44x128xf32, #tpu.memory_space<vmem>>, vector<1x128xf32>
    %541 = arith.addf %539, %540 : vector<1x128xf32>
    %c0_188 = arith.constant 0 : index
    %c0_189 = arith.constant 0 : index
    %c0_190 = arith.constant 0 : index
    %542 = vector.load %arg5[%c0_188, %c0_189, %c0_190] : memref<1x1x128xf32, #tpu.memory_space<vmem>>, vector<1x1x128xf32>
    %543 = vector.shape_cast %542 : vector<1x1x128xf32> to vector<1x128xf32>
    %544 = vector.shape_cast %541 : vector<1x128xf32> to vector<1x1x128xf32>
    tpu.vector_store %arg5[%c0_188, %c0_189, %c0_190], %544 {strides = array<i32>} : memref<1x1x128xf32, #tpu.memory_space<vmem>>, vector<1x1x128xf32>,
    return
  }
  func.func @transform_0(%arg0: i32) -> (i32, i32, i32) {
    %c0_i32 = arith.constant 0 : i32
    %c0_i32_0 = arith.constant 0 : i32
    %c0_i32_1 = arith.constant 0 : i32
    return %arg0, %c0_i32, %c0_i32_0 : i32, i32, i32
  }
  func.func @transform_1(%arg0: i32) -> (i32, i32, i32) {
    %c0_i32 = arith.constant 0 : i32
    %c0_i32_0 = arith.constant 0 : i32
    %c0_i32_1 = arith.constant 0 : i32
    return %arg0, %c0_i32, %c0_i32_0 : i32, i32, i32
  }
  func.func @transform_2(%arg0: i32) -> (i32, i32) {
    %c0_i32 = arith.constant 0 : i32
    %c0_i32_0 = arith.constant 0 : i32
    %c0_i32_1 = arith.constant 0 : i32
    return %c0_i32, %c0_i32_0 : i32, i32
  }
  func.func @transform_3(%arg0: i32) -> (i32, i32) {
    %c0_i32 = arith.constant 0 : i32
    %c0_i32_0 = arith.constant 0 : i32
    %c0_i32_1 = arith.constant 0 : i32
    return %c0_i32, %c0_i32_0 : i32, i32
  }
  func.func @transform_4(%arg0: i32) -> (i32, i32, i32) {
    %c0_i32 = arith.constant 0 : i32
    %c0_i32_0 = arith.constant 0 : i32
    %c0_i32_1 = arith.constant 0 : i32
    return %arg0, %c0_i32, %c0_i32_0 : i32, i32, i32
  }
}

</mosaic_0001>

<bundles_post_ra>
// kernel: canine_classifier_forward.1
= control target key start
LH: loop header
LB: loop body
LE: loop exit
PB: predicated region body
PF: predicated region fallthrough
CT: control target
= control target key end

     0   :  { %9 = vsyncpa [#allocation3], 0  ;;  %s2853_s0 = inlined_call_operand.vmem [shape: s32[2,16,1], index: 0, kind: input, shape index: {}]   ;;  %s2854_s1 = inlined_call_operand.vmem [shape: f32[2,2,128], index: 1, kind: input, shape index: {}]   ;;  %s2855_s2 = inlined_call_operand.hbm [shape: f32[992,128], index: 2, kind: input, shape index: {}]   ;;  %s2856_s3 = inlined_call_operand.hbm [shape: f32[44,128], index: 3, kind: input, shape index: {}]   ;;  %s2857_s4 = inlined_call_operand.hbm [shape: f32[2,1,128], index: 4, kind: output, shape index: {}]  }
   0x1   :  { %10 = vsyncpa [#allocation6], 0 }
   0x2   :  { %11 = vsyncpa [#allocation4], 0 }
   0x3   :  { %13 = vsyncpa [#allocation4 + $0x1], 0  ;;  %s2511_s15 = smov 0   ;;  %s2513_s16 = smov 0  }
   0x4   :  { %s2515_s17 = smov 0   ;;  %s2517_s18 = smov 0  }
   0x5 LB: > { %s2532_s19 = sadd.s32 4294967295, %s2476_s18   ;;  %s2096_s20 = sadd.s32 4294967294, %s2476_s18   ;;  %s2476_s18 = sphi %s2517_s18, %s2864_s18   ;;  %s2472_s17 = sphi %s2515_s17, %s2863_s17   ;;  %s2468_s16 = sphi %s2513_s16, %s2862_s16   ;;  %s2464_s15 = sphi %s2511_s15, %s2861_s15  }
   0x6   : > { %s2536_s21 = sadd.s32 1, %s2476_s18   ;;  %s120_s22 = sadd.s32 1, %s2472_s17 }
   0x7   : > { %s117_s23 = ssub.s32 %s2476_s18, %s2536_s21  ;;  %p130_p0 = scmp.ne.s32.totalorder %s2472_s17, %s2468_s16 }
   0x8   : > { %p118_p1 = scmp.eq.s32.totalorder %s117_s23, 0  ;;  %p131_p2 = scmp.eq.s32.totalorder %s2532_s19, 1 }
   0x9   : > { %p136_p3 = scmp.ne.s32.totalorder %s2468_s16, %s2464_s15  ;;  %p137_p4 = scmp.eq.s32.totalorder %s2096_s20, 1 }
   0xa   : > { %s2547_s24 = scalar_select %p118_p1, %s2472_s17, %s120_s22  }
   0xb   : > { %p2549_p5 = por %p131_p2, %p130_p0  ;;  %p2553_p6 = por %p137_p4, %p136_p3 }
   0xc   : > { %p2097_p7 = scmp.ge.s32.totalorder %s2476_s18, 1  ;;  %p144_p8 = scmp.lt.s32.totalorder %s2476_s18, 3 }
   0xd   : > { %p2206_p9 = scmp.eq.s32.totalorder %s2532_s19, 0  ;;  %s155_s30 = sshll.u32 %s2855_s2, 4  ;;  %s156_s30 = int_to_ptr.hbm [resolvable:$true] %s155_s30 }
   0xe   : > { %p2560_p10 = pnand %p2097_p7, %p144_p8  ;;  %s2478_s5 = smov [#allocation2]  }
   0xf   : > { %s157_s6 = sshll.u32 %s2478_s5, 4  ;;  %s169_s9 = sshll.u32 %s2856_s3, 4  ;;  %s158_s6 = int_to_ptr.vmem [resolvable:$true] %s157_s6  ;;  %s170_s9 = int_to_ptr.hbm [resolvable:$true] %s169_s9 }
  0x10   : > { %p2195_p11 = pneg %p2560_p10  ;;  %s2479_s10 = smov 128  }
  0x11   : > { %s2480_s11 = smov 8   ;;  %s2481_s12 = smov [#allocation5]  }
  0x12   : > { %p2196_p12 = pnand %p2206_p9, %p2195_p11  ;;  %s171_s13 = sshll.u32 %s2481_s12, 4  ;;  %s172_s13 = int_to_ptr.vmem [resolvable:$true] %s171_s13 }
  0x13   : > { %202 = sbr.rel (%p2560_p10) target bundleno = 5471 (0x155f), region = 36 }
  0x14   : > { %2198 = dma.hbm_to_vmem [thread:$0]  (!%p2196_p12), %s156_s30, 15872, %s158_s6, [#allocation3], %s2479_s10, %s2479_s10, %s2480_s11  }
  0x15   : > { %2201 = dma.hbm_to_vmem [thread:$0]  (!%p2196_p12), %s170_s9, 768, %s172_s13, [#allocation6], %s2479_s10, %s2479_s10, %s2480_s11  }
  0x18   : > { %2451 = dma.done.wait (%p2206_p9), [#allocation3], 15872  }
  0x19   : > { %2453 = vsyncadd (%p2206_p9), [#allocation3], 4294951424 }
  0x1a   : > { %2455 = dma.done.wait (%p2206_p9), [#allocation6], 768  }
  0x1b   : > { %2457 = vsyncadd (%p2206_p9), [#allocation6], 4294966528  ;;  %p237_p13 = scmp.lt.s32.totalorder %s2532_s19, 1  ;;  %v2482_v0 = vmov 0   ;;  %v317_v3 = vld [vmem:[#allocation2 + $0x78] sm:$0xff]  ;;  %v316_v4 = vld [vmem:[#allocation2 + $0x70] sm:$0xff]  ;;  %v249_v18 = vlaneseq  ;;  %s2003_s9 = scalar_lea.hbm %s2857_s4, %s2532_s19 }
  0x1c   : > { %2251 = vset.pattern.permute.xlu0 %v2482_v0  ;;  %320 = vmatpush.msra.mxu0 %v317_v3  ;;  %v315_v5 = vld [vmem:[#allocation2 + $0x68] sm:$0xff]  ;;  %v314_v7 = vld [vmem:[#allocation2 + $0x60] sm:$0xff]  ;;  %v313_v9 = vld [vmem:[#allocation2 + $0x58] sm:$0xff]  ;;  %v2483_v35 = vmov 1.0   ;;  %v2484_v51 = vmov 32.0   ;;  %s235_s6 = sand.u32 1, %s2468_s16  }
  0x1d   : > { %s2586_s14 = scalar_select %p237_p13, %s2532_s19, 1  ;;  %v312_v10 = vld [vmem:[#allocation2 + $0x50] sm:$0xff]  ;;  %v311_v11 = vld [vmem:[#allocation2 + $0x48] sm:$0xff]  ;;  %v310_v12 = vld [vmem:[#allocation2 + $0x40] sm:$0xff]  ;;  %v2593_v20 = vand.u32 127, %v249_v18  ;;  %2278 = vrcp.f32 %v2484_v51 }
  0x1e   : > { %321 = vmatpush.msra.mxu0 %v316_v4  ;;  %v309_v13 = vld [vmem:[#allocation2 + $0x38] sm:$0xff]  ;;  %v308_v14 = vld [vmem:[#allocation2 + $0x30] sm:$0xff]  ;;  %v307_v15 = vld [vmem:[#allocation2 + $0x28] sm:$0xff]  ;;  %s236_s10 = scalar_lea.vmem [#allocation7], %s235_s6  ;;  %s2007_s12 = sshll.u32 %s2003_s9, 4  ;;  %s2008_s12 = int_to_ptr.hbm [resolvable:$true] %s2007_s12 }
  0x1f   : > { %s2184_s20 = sshll.u32 %s2586_s14, 4  ;;  %v306_v16 = vld [vmem:[#allocation2 + $0x20] sm:$0xff]  ;;  %v305_v17 = vld [vmem:[#allocation2 + $0x18] sm:$0xff]  ;;  %v304_v19 = vld [vmem:[#allocation2 + $0x10] sm:$0xff]  ;;  %vm252_vm0 = vcmp.lt.s32.totalorder %v2593_v20, 16  ;;  %vm255_vm1 = vcmp.ge.s32.totalorder %v2593_v20, 16 }
  0x20   : > { %s241_s27 = scalar_lea.vmem %s2853_s0, %s2184_s20  ;;  %322 = vmatpush.msra.mxu0 %v315_v5  ;;  %v303_v21 = vld [vmem:[#allocation2 + $0x8] sm:$0xff]  ;;  %v302_v22 = vld [vmem:[#allocation2] sm:$0xff]  ;;  %vm256_vm2 = vcmp.lt.s32.totalorder %v2593_v20, 32  ;;  %v254_v23 = vsel %vm252_vm0, 31, %v2482_v0  ;;  %vm259_vm4 = vcmp.ge.s32.totalorder %v2593_v20, 32  ;;  %vm260_vm5 = vcmp.lt.s32.totalorder %v2593_v20, 48 }
  0x21   : > { %v246_v1 = vld [vmem:[%s241_s27] sm:$0xff]  ;;  %v247_v6 = vld [vmem:[%s241_s27 + $0x8] sm:$0xff]  ;;  %vm257_vm3 = vmand %vm255_vm1, %vm256_vm2  ;;  %vm263_vm7 = vcmp.ge.s32.totalorder %v2593_v20, 48  ;;  %vm264_vm8 = vcmp.lt.s32.totalorder %v2593_v20, 64  ;;  %vm267_vm10 = vcmp.ge.s32.totalorder %v2593_v20, 64  ;;  %vm268_vm11 = vcmp.lt.s32.totalorder %v2593_v20, 80 }
  0x22   : > { %v283_v2 = vadd.s32 1, %v246_v1  ;;  %v284_v8 = vadd.s32 1, %v247_v6  ;;  %323 = vmatpush.msra.mxu0 %v314_v7  ;;  %v258_v24 = vsel %vm257_vm3, 43, %v254_v23  ;;  %vm261_vm6 = vmand %vm259_vm4, %vm260_vm5  ;;  %vm271_vm13 = vcmp.ge.s32.totalorder %v2593_v20, 80  ;;  %v318_v39 = vld [vmem:[#allocation5] sm:$0xff]  ;;  %v319_v43 = vld [vmem:[#allocation5 + $0x8] sm:$0xff] }
  0x23   : > { %v262_v25 = vsel %vm261_vm6, 59, %v258_v24  ;;  %vm265_vm9 = vmand %vm263_vm7, %vm264_vm8  ;;  %vm272_vm14 = vcmp.lt.s32.totalorder %v2593_v20, 96  ;;  %vm275_vm0 = vcmp.ge.s32.totalorder %v2593_v20, 96  ;;  %vm276_vm1 = vcmp.lt.s32.totalorder %v2593_v20, 112  ;;  %v2279_v52 = vpop.eup %2278  ;;  %v411_v57 = vld [vmem:[#allocation2 + $0x98] sm:$0xff]  ;;  %v410_v59 = vld [vmem:[#allocation2 + $0x90] sm:$0xff] }
  0x24   : > { %286 = vperm.xlu0 %2251, %v283_v2   ;;  %324 = vmatpush.msra.mxu0 %v313_v9  ;;  %v266_v26 = vsel %vm265_vm9, 61, %v262_v25  ;;  %vm269_vm12 = vmand %vm267_vm10, %vm268_vm11  ;;  %vm279_vm3 = vcmp.ge.s32.totalorder %v2593_v20, 112  ;;  %v295_v33 = vand.u32 15, %v2593_v20  ;;  %vm345_vm6 = vcmask 261120   ;;  %v409_v61 = vld [vmem:[#allocation2 + $0x88] sm:$0xff]  ;;  %v408_v63 = vld [vmem:[#allocation2 + $0x80] sm:$0xff] }
  0x25   : > { %v270_v27 = vsel %vm269_vm12, 73, %v266_v26  ;;  %vm273_vm15 = vmand %vm271_vm13, %vm272_vm14  ;;  %v353_v53 = vmul.f32 32.0, %v2279_v52  ;;  %vm357_vm7 = vweird.f32 %v2279_v52  ;;  %434 = vmatpush.msra.mxu1 %v411_v57  ;;  %s2106_s28 = sshll.u32 %s2586_s14, 1  ;;  %vm483_vm14 = vcmask 130048   ;;  %s2005_s11 = sshll.u32 %s236_s10, 4  ;;  %s2006_s11 = int_to_ptr.vmem [resolvable:$true] %s2005_s11 }
  0x26   : > { %325 = vmatpush.msra.mxu0 %v312_v10  ;;  %v274_v28 = vsel %vm273_vm15, 97, %v270_v27  ;;  %vm277_vm2 = vmand %vm275_vm0, %vm276_vm1  ;;  %v2252_v27 = vld [vmem:[#allocation5 + $0x10] ss:$0 sm:$0xff]  ;;  %s245_s5 = scalar_lea.vmem %s2854_s1, %s2106_s28  ;;  %s1995_s13 = scalar_lea.sflag [#allocation4], %s235_s6 }
  0x27   : > { %v278_v29 = vsel %vm277_vm2, 103, %v274_v28  ;;  %v354_v54 = vsub.f32 1.0, %v353_v53  ;;  %435 = vmatpush.msra.mxu1 %v410_v59  ;;  %s2420_s14 = sshra.s32 %s2008_s12, 4  ;;  %s2426_s19 = scalar_lea.hbm %s2857_s4, 2  ;;  %s2421_s14 = int_to_ptr.hbm [resolvable:$true] %s2420_s14 }
  0x28   : > { %326 = vmatpush.msra.mxu0 %v311_v11  ;;  %v282_v30 = vsel %vm279_vm3, 113, %v278_v29  ;;  %v557_v11 = vld [vmem:[#allocation2 + $0xb0] sm:$0xff]  ;;  %s2422_s20 = scalar_lea.hbm %s2421_s14, 1  ;;  %p2427_p3 = scmp.lt.s32.totalorder %s2421_s14, %s2857_s4 }
  0x29   : > { %v355_v55 = vmul.f32 %v2279_v52, %v354_v54  ;;  %436 = vmatpush.msra.mxu1 %v409_v61  ;;  %p2423_p0 = scmp.ne.s32.totalorder %s2421_s14, %s2422_s20  ;;  %p2428_p4 = scmp.lt.s32.totalorder %s2426_s19, %s2422_s20 }
  0x2a   : > { %327 = vmatpush.msra.mxu0 %v310_v12 }
  0x2b   : > { %v356_v56 = vadd.f32 %v2279_v52, %v355_v55  ;;  %437 = vmatpush.msra.mxu1 %v408_v63  ;;  %p2424_p1 = pnand %p2423_p0, %p2549_p5  ;;  %p2429_p7 = por %p2428_p4, %p2427_p3 }
  0x2c   : > { %289 = vperm.xlu0 %2251, %v284_v8   ;;  %328 = vmatpush.msra.mxu0 %v309_v13  ;;  %v558_v8 = vld [vmem:[#allocation2 + $0xb8] sm:$0xff]  ;;  %v556_v13 = vld [vmem:[#allocation2 + $0xa8] sm:$0xff] }
  0x2d   : > { %v2624_v60 = vsel %vm357_vm7, %v2279_v52, %v356_v56  ;;  %575 = vmatpush.msrb.mxu1 %v558_v8  ;;  %p2425_p2 = pneg %p2424_p1 }
  0x2e   : > { %329 = vmatpush.msra.mxu0 %v308_v14  ;;  %v555_v14 = vld [vmem:[#allocation2 + $0xa0] sm:$0xff] }
  0x2f   : > { %576 = vmatpush.msrb.mxu1 %v557_v11  ;;  %v413_v11 = vld [vmem:[#allocation2 + $0xc8] sm:$0xff]  ;;  %p2430_p8 = pnand %p2429_p7, %p2425_p2 }
  0x30   : > { %330 = vmatpush.msra.mxu0 %v307_v15 }
  0x31   : > { %577 = vmatpush.msrb.mxu1 %v556_v13 }
  0x32   : > { %331 = vmatpush.msra.mxu0 %v306_v16 }
  0x33   : > { %578 = vmatpush.msrb.mxu1 %v555_v14 }
  0x34   : > { %332 = vmatpush.msra.mxu0 %v305_v17 }
  0x36   : > { %333 = vmatpush.msra.mxu0 %v304_v19 }
  0x38   : > { %334 = vmatpush.msra.mxu0 %v303_v21 }
  0x3a   : > { %335 = vmatpush.msra.mxu0 %v302_v22 }
  0x96   : > { %v287_v31 = vpop.permute.xlu0 %286 }
  0x97   : > { %v291_v32 = vmul.u32 %v287_v31, %v282_v30 }
  0x99   : > { %v293_v34 = vand.u32 15, %v291_v32 }
  0x9b   : > { %vm296_vm4 = vcmp.eq.s32.totalorder %v293_v34, %v295_v33 }
  0x9c   : > { %2109 = vmatmul.msk.f32.vlgmr.msra.gmra.mxu0 %vm296_vm4, %v2483_v35 }
  0x9e   : > { %v290_v36 = vpop.permute.xlu0 %289 }
  0x9f   : > { %v292_v37 = vmul.u32 %v290_v36, %v282_v30  ;;  %v2253_v30 = vld [vmem:[#allocation5 + $0x11] ss:$0 sm:$0xff] }
  0xa1   : > { %v294_v38 = vand.u32 15, %v292_v37 }
  0xa3   : > { %vm297_vm5 = vcmp.eq.s32.totalorder %v294_v38, %v295_v33 }
  0xa4   : > { %2110 = vmatmul.msk.f32.gmra.mxu0 %vm297_vm5, %v2483_v35  ;;  %vm814_vm5 = vcmask 523264  }
 0x119   : > { %v337_v40 = vpop.f32.mrf.mxu0 }
 0x11a   : > { %v2610_v41 = vadd.f32 %v337_v40, %v318_v39 }
 0x11c   : > { %v346_v42 = vsel %vm345_vm6, %v2610_v41, 0.0  ;;  %v361_v44 = vmul.f32 %v2610_v41, %v2610_v41 }
 0x11d   : > { %347 = vadd.xlane.f32.xlu1 %v346_v42 }
 0x11e   : > { %v363_v47 = vsel %vm345_vm6, %v361_v44, 0.0 }
 0x121   : > { %v340_v45 = vpop.f32.mrf.mxu0 }
 0x122   : > { %v2616_v46 = vadd.f32 %v340_v45, %v319_v43 }
 0x124   : > { %v349_v48 = vsel %vm345_vm6, %v2616_v46, 0.0  ;;  %v362_v49 = vmul.f32 %v2616_v46, %v2616_v46 }
 0x125   : > { %364 = vadd.xlane.f32.xlu1 %v363_v47  ;;  %350 = vadd.xlane.f32.xlu2 %v349_v48 }
 0x126   : > { %v366_v50 = vsel %vm345_vm6, %v362_v49, 0.0 }
 0x12d   : > { %367 = vadd.xlane.f32.xlu2 %v366_v50 }
 0x190   : > { %v348_v58 = vpop.xlane.xlu1 %347 }
 0x191   : > { %v359_v62 = vmul.f32 %v2624_v60, %v348_v58 }
 0x193   : > { %v371_v2 = vmul.f32 %v359_v62, %v359_v62  ;;  %v375_v26 = vsub.f32 %v2610_v41, %v359_v62 }
 0x198   : > { %v365_v0 = vpop.xlane.xlu1 %364  ;;  %v351_v1 = vpop.xlane.xlu2 %350 }
 0x199   : > { %v369_v3 = vmul.f32 %v365_v0, %v2624_v60  ;;  %v360_v6 = vmul.f32 %v2624_v60, %v351_v1 }
 0x19b   : > { %v373_v4 = vsub.f32 %v369_v3, %v371_v2  ;;  %v372_v9 = vmul.f32 %v360_v6, %v360_v6  ;;  %v376_v37 = vsub.f32 %v2616_v46, %v360_v6  ;;  %v2662_v46 = vld [vmem:[%s245_s5] sm:$0x3] }
 0x19c   : > { %v476_v47 = vperm.slane %v2662_v46, 0 }
 0x19d   : > { %v377_v5 = vadd.f32 1e-12, %v373_v4 }
 0x19f   : > { %2280 = vrsqrt.f32 %v377_v5  ;;  %vm385_vm9 = vweird.f32 %v377_v5 }
 0x1a0   : > { %v368_v7 = vpop.xlane.xlu2 %367 }
 0x1a1   : > { %v370_v10 = vmul.f32 %v368_v7, %v2624_v60 }
 0x1a3   : > { %v374_v12 = vsub.f32 %v370_v10, %v372_v9  ;;  %v415_v9 = vld [vmem:[#allocation2 + $0xd8] sm:$0xff]  ;;  %v414_v10 = vld [vmem:[#allocation2 + $0xd0] sm:$0xff] }
 0x1a5   : > { %v2281_v15 = vpop.eup %2280  ;;  %v378_v16 = vadd.f32 1e-12, %v374_v12  ;;  %v412_v12 = vld [vmem:[#allocation2 + $0xc0] sm:$0xff] }
 0x1a6   : > { %v380_v17 = vmul.f32 %v2281_v15, %v377_v5  ;;  %vm386_vm8 = vweird.f32 %v2281_v15 }
 0x1a7   : > { %2282 = vrsqrt.f32 %v378_v16  ;;  %vm387_vm10 = vmor %vm385_vm9, %vm386_vm8  ;;  %vm395_vm12 = vweird.f32 %v378_v16 }
 0x1a8   : > { %v381_v19 = vmul.f32 %v2281_v15, %v380_v17 }
 0x1aa   : > { %v382_v21 = vmul.f32 0.5, %v381_v19 }
 0x1ac   : > { %v383_v22 = vsub.f32 1.5, %v382_v21 }
 0x1ad   : > { %v2283_v23 = vpop.eup %2282 }
 0x1ae   : > { %v384_v24 = vmul.f32 %v2281_v15, %v383_v22  ;;  %v390_v25 = vmul.f32 %v2283_v23, %v378_v16  ;;  %vm396_vm11 = vweird.f32 %v2283_v23 }
 0x1af   : > { %vm397_vm13 = vmor %vm395_vm12, %vm396_vm11 }
 0x1b0   : > { %v388_v28 = vsel %vm387_vm10, %v2281_v15, %v384_v24  ;;  %v391_v29 = vmul.f32 %v2283_v23, %v390_v25 }
 0x1b1   : > { %v399_v31 = vmul.f32 %v388_v28, %v375_v26 }
 0x1b2   : > { %v392_v32 = vmul.f32 0.5, %v391_v29  ;;  %v562_v29 = vld [vmem:[#allocation2 + $0xf8] sm:$0xff] }
 0x1b3   : > { %v402_v33 = vmul.f32 %v2252_v27, %v399_v31  ;;  %v560_v31 = vld [vmem:[#allocation2 + $0xe8] sm:$0xff] }
 0x1b4   : > { %v393_v34 = vsub.f32 1.5, %v392_v32  ;;  %v559_v32 = vld [vmem:[#allocation2 + $0xe0] sm:$0xff] }
 0x1b5   : > { %v2631_v35 = vadd.f32 %v2253_v30, %v402_v33 }
 0x1b6   : > { %v394_v36 = vmul.f32 %v2283_v23, %v393_v34 }
 0x1b7   : > { %2111 = vmatmul.msk.f32.vlgmr.msra.gmra.mxu1 %vm345_vm6, %v2631_v35 }
 0x1b8   : > { %v398_v38 = vsel %vm397_vm13, %v2283_v23, %v394_v36  ;;  %680 = vmatpush.msra.mxu1 %v562_v29 }
 0x1b9   : > { %v400_v39 = vmul.f32 %v398_v38, %v376_v37  ;;  %v2254_v38 = vld [vmem:[#allocation5 + $0x12] ss:$0 sm:$0xff] }
 0x1bb   : > { %v403_v40 = vmul.f32 %v2252_v27, %v400_v39 }
 0x1bd   : > { %v2636_v41 = vadd.f32 %v2253_v30, %v403_v40  ;;  %v561_v30 = vld [vmem:[#allocation2 + $0xf0] sm:$0xff] }
 0x1be   : > { %681 = vmatpush.msra.mxu1 %v561_v30 }
 0x1bf   : > { %2112 = vmatmul.msk.f32.gmra.mxu1 %vm345_vm6, %v2636_v41  ;;  %2113 = vmatpush.xpose.msk.msra.mxu2 %vm345_vm6, %v2636_v41 }
 0x1c0   : > { %514 = vmatpush.msra.mxu3 %v2636_v41  ;;  %682 = vmatpush.msra.mxu1 %v560_v31 }
 0x1c2   : > { %515 = vmatpush.msra.mxu3 %v2631_v35  ;;  %683 = vmatpush.msra.mxu1 %v559_v32 }
 0x1c3   : > { %2114 = vmatpush.xpose.msk.msra.mxu2 %vm345_vm6, %v2631_v35 }
 0x1c4   : > { %541 = vmatpush.msrb.mxu3 %v415_v9 }
 0x1c6   : > { %542 = vmatpush.msrb.mxu3 %v414_v10 }
 0x1c7   : > { %2123 = vmatpush.xpose.msk.msrb.mxu2 %vm345_vm6, %v2636_v41  ;;  %2121 = vmatmul.msk.f32.vlgmr.msrb.gmra.mxu1 %vm345_vm6, %v2631_v35 }
 0x1c8   : > { %543 = vmatpush.msrb.mxu3 %v413_v11 }
 0x1ca   : > { %544 = vmatpush.msrb.mxu3 %v412_v12 }
 0x1cb   : > { %2124 = vmatpush.xpose.msk.msrb.mxu2 %vm345_vm6, %v2631_v35 }
 0x1cf   : > { %2122 = vmatmul.msk.f32.gmra.mxu1 %vm345_vm6, %v2636_v41 }
 0x234   : > { %v439_v42 = vpop.f32.mrf.mxu1 }
 0x235   : > { %2115 = vmatmul.msk.f32.vlgmr.msra.gmra.mxu2 %vm345_vm6, %v439_v42 }
 0x23c   : > { %v442_v43 = vpop.f32.mrf.mxu1 }
 0x23d   : > { %2116 = vmatmul.msk.f32.gmra.mxu2 %vm345_vm6, %v442_v43 }
 0x244   : > { %v580_v44 = vpop.f32.mrf.mxu1 }
 0x245   : > { %2125 = vmatmul.msk.f32.vlgmr.msrb.gmra.mxu2 %vm345_vm6, %v580_v44 }
 0x24c   : > { %v583_v45 = vpop.f32.mrf.mxu1 }
 0x24d   : > { %2126 = vmatmul.msk.f32.gmra.mxu2 %vm345_vm6, %v583_v45 }
 0x2b8   : > { %v468_v48 = vpop.f32.mrf.mxu2 }
 0x2b9   : > { %v474_v49 = vmul.f32 0.25, %v468_v48 }
 0x2bb   : > { %v477_v50 = vadd.f32 %v476_v47, %v474_v49 }
 0x2bd   : > { %v479_v51 = vmul.f32 1.442695, %v477_v50 }
 0x2bf   : > { %2284 = vpow2.f32 %v479_v51 }
 0x2c0   : > { %v471_v52 = vpop.f32.mrf.mxu2 }
 0x2c1   : > { %v475_v53 = vmul.f32 0.25, %v471_v52 }
 0x2c3   : > { %v478_v54 = vadd.f32 %v476_v47, %v475_v53 }
 0x2c5   : > { %v2285_v55 = vpop.eup %2284  ;;  %v481_v56 = vmul.f32 1.442695, %v478_v54 }
 0x2c6   : > { %v484_v57 = vsel %vm483_vm14, %v2285_v55, 0.0 }
 0x2c7   : > { %2286 = vpow2.f32 %v481_v56  ;;  %485 = vadd.xlane.f32.xlu0 %v484_v57  ;;  %v752_v56 = vld [vmem:[#allocation2 + $0x108] sm:$0xff] }
 0x2c8   : > { %v609_v58 = vpop.f32.mrf.mxu2 }
 0x2c9   : > { %v615_v59 = vmul.f32 0.25, %v609_v58  ;;  %v751_v58 = vld [vmem:[#allocation2 + $0x100] sm:$0xff] }
 0x2cb   : > { %v617_v61 = vadd.f32 %v615_v59, %v476_v47 }
 0x2cd   : > { %v2287_v62 = vpop.eup %2286  ;;  %v619_v63 = vmul.f32 1.442695, %v617_v61 }
 0x2ce   : > { %v487_v0 = vsel %vm483_vm14, %v2287_v62, 0.0 }
 0x2cf   : > { %2288 = vpow2.f32 %v619_v63  ;;  %488 = vadd.xlane.f32.xlu1 %v487_v0 }
 0x2d0   : > { %v612_v1 = vpop.f32.mrf.mxu2 }
 0x2d1   : > { %v616_v2 = vmul.f32 0.25, %v612_v1 }
 0x2d3   : > { %v618_v3 = vadd.f32 %v616_v2, %v476_v47 }
 0x2d5   : > { %v2289_v4 = vpop.eup %2288  ;;  %v621_v5 = vmul.f32 1.442695, %v618_v3 }
 0x2d6   : > { %v623_v6 = vsel %vm483_vm14, %v2289_v4, 0.0 }
 0x2d7   : > { %2290 = vpow2.f32 %v621_v5  ;;  %624 = vadd.xlane.f32.xlu2 %v623_v6 }
 0x2dd   : > { %v2291_v7 = vpop.eup %2290 }
 0x2de   : > { %v626_v8 = vsel %vm483_vm14, %v2291_v7, 0.0 }
 0x2df   : > { %627 = vadd.xlane.f32.xlu1 %v626_v8 }
 0x33a   : > { %v486_v13 = vpop.xlane.xlu0 %485 }
 0x33b   : > { %2292 = vrcp.f32 %v486_v13 }
 0x341   : > { %v2293_v14 = vpop.eup %2292 }
 0x342   : > { %v489_v15 = vpop.xlane.xlu1 %488  ;;  %v492_v16 = vmul.f32 %v2293_v14, %v2285_v55  ;;  %v753_v55 = vld [vmem:[#allocation2 + $0x110] sm:$0xff] }
 0x343   : > { %2294 = vrcp.f32 %v489_v15 }
 0x344   : > { %2117 = vmatmul.msk.f32.vlgmr.msra.gmra.mxu3 %vm483_vm14, %v492_v16 }
 0x345   : > { %653 = vmatpush.msra.mxu3 %v2636_v41 }
 0x347   : > { %654 = vmatpush.msra.mxu3 %v2631_v35 }
 0x349   : > { %v2295_v17 = vpop.eup %2294 }
 0x34a   : > { %v493_v19 = vmul.f32 %v2295_v17, %v2287_v62  ;;  %v625_v22 = vpop.xlane.xlu2 %624  ;;  %v2255_v17 = vld [vmem:[#allocation5 + $0x13] ss:$0 sm:$0xff] }
 0x34b   : > { %2296 = vrcp.f32 %v625_v22 }
 0x34c   : > { %2118 = vmatmul.msk.f32.gmra.mxu3 %vm483_vm14, %v493_v19 }
 0x351   : > { %v2297_v25 = vpop.eup %2296 }
 0x352   : > { %v628_v24 = vpop.xlane.xlu1 %627  ;;  %v631_v26 = vmul.f32 %v2297_v25, %v2289_v4 }
 0x353   : > { %2298 = vrcp.f32 %v628_v24 }
 0x359   : > { %v2299_v27 = vpop.eup %2298 }
 0x35a   : > { %v632_v28 = vmul.f32 %v2299_v27, %v2291_v7 }
 0x3c7   : > { %v517_v21 = vpop.f32.mrf.mxu3 }
 0x3c8   : > { %2119 = vmatmul.msk.f32.vlgmr.msrb.gmra.mxu3 %vm345_vm6, %v517_v21 }
 0x3cf   : > { %v520_v23 = vpop.f32.mrf.mxu3 }
 0x3d0   : > { %2120 = vmatmul.msk.f32.gmra.mxu3 %vm345_vm6, %v520_v23  ;;  %v2256_v23 = vld [vmem:[#allocation5 + $0x14] ss:$0 sm:$0xff] }
 0x3d8   : > { %2127 = vmatmul.msk.f32.vlgmr.msra.gmra.mxu3 %vm483_vm14, %v631_v26 }
 0x3e0   : > { %2128 = vmatmul.msk.f32.gmra.mxu3 %vm483_vm14, %v632_v28 }
 0x44b   : > { %v546_v33 = vpop.f32.mrf.mxu3 }
 0x44c   : > { %v553_v39 = vadd.f32 %v2254_v38, %v546_v33 }
 0x453   : > { %v549_v34 = vpop.f32.mrf.mxu3 }
 0x454   : > { %v554_v47 = vadd.f32 %v2254_v38, %v549_v34  ;;  %v763_v34 = vld [vmem:[#allocation2 + $0x158] sm:$0xff]  ;;  %v760_v38 = vld [vmem:[#allocation2 + $0x140] sm:$0xff] }
 0x455   : > { %829 = vmatpush.msrb.mxu0 %v763_v34 }
 0x45b   : > { %v656_v36 = vpop.f32.mrf.mxu3 }
 0x45c   : > { %2129 = vmatmul.msk.f32.vlgmr.msra.gmra.mxu1 %vm345_vm6, %v656_v36  ;;  %v762_v36 = vld [vmem:[#allocation2 + $0x150] sm:$0xff] }
 0x45d   : > { %830 = vmatpush.msrb.mxu0 %v762_v36 }
 0x463   : > { %v659_v37 = vpop.f32.mrf.mxu3 }
 0x464   : > { %2130 = vmatmul.msk.f32.gmra.mxu1 %vm345_vm6, %v659_v37  ;;  %v761_v37 = vld [vmem:[#allocation2 + $0x148] sm:$0xff] }
 0x465   : > { %831 = vmatpush.msrb.mxu0 %v761_v37  ;;  %v935_v37 = vld [vmem:[#allocation2 + $0x338] sm:$0xff] }
 0x466   : > { %951 = vmatpush.msrb.mxu1 %v935_v37 }
 0x467   : > { %832 = vmatpush.msrb.mxu0 %v760_v38  ;;  %v934_v38 = vld [vmem:[#allocation2 + $0x330] sm:$0xff] }
 0x468   : > { %952 = vmatpush.msrb.mxu1 %v934_v38 }
 0x4d9   : > { %v685_v40 = vpop.f32.mrf.mxu1 }
 0x4da   : > { %v691_v42 = vadd.f32 %v685_v40, %v553_v39  ;;  %v759_v39 = vld [vmem:[#allocation2 + $0x138] sm:$0xff]  ;;  %v758_v40 = vld [vmem:[#allocation2 + $0x130] sm:$0xff] }
 0x4db   : > { %833 = vmatpush.msrb.mxu0 %v759_v39 }
 0x4dc   : > { %v693_v43 = vadd.f32 %v691_v42, %v2631_v35  ;;  %v754_v35 = vld [vmem:[#allocation2 + $0x118] sm:$0xff]  ;;  %v757_v42 = vld [vmem:[#allocation2 + $0x128] sm:$0xff] }
 0x4dd   : > { %784 = vmatpush.msra.mxu2 %v754_v35  ;;  %834 = vmatpush.msrb.mxu0 %v758_v40 }
 0x4de   : > { %v697_v44 = vsel %vm345_vm6, %v693_v43, 0.0  ;;  %v705_v45 = vmul.f32 %v693_v43, %v693_v43 }
 0x4df   : > { %698 = vadd.xlane.f32.xlu2 %v697_v44  ;;  %785 = vmatpush.msra.mxu2 %v753_v55  ;;  %v2257_v44 = vld [vmem:[#allocation5 + $0x15] ss:$0 sm:$0xff] }
 0x4e0   : > { %v707_v48 = vsel %vm345_vm6, %v705_v45, 0.0  ;;  %835 = vmatpush.msrb.mxu0 %v757_v42  ;;  %v933_v42 = vld [vmem:[#allocation2 + $0x328] sm:$0xff] }
 0x4e1   : > { %708 = vadd.xlane.f32.xlu1 %v707_v48  ;;  %v688_v49 = vpop.f32.mrf.mxu1  ;;  %786 = vmatpush.msra.mxu2 %v752_v56 }
 0x4e2   : > { %v692_v50 = vadd.f32 %v688_v49, %v554_v47  ;;  %953 = vmatpush.msrb.mxu1 %v933_v42  ;;  %v1140_v42 = vadd.s32 1, %v2593_v20 }
 0x4e3   : > { %787 = vmatpush.msra.mxu2 %v751_v58 }
 0x4e4   : > { %v694_v51 = vadd.f32 %v692_v50, %v2636_v41 }
 0x4e6   : > { %v700_v52 = vsel %vm345_vm6, %v694_v51, 0.0  ;;  %v706_v53 = vmul.f32 %v694_v51, %v694_v51 }
 0x4e7   : > { %701 = vadd.xlane.f32.xlu2 %v700_v52 }
 0x4e8   : > { %v710_v54 = vsel %vm345_vm6, %v706_v53, 0.0 }
 0x4e9   : > { %711 = vadd.xlane.f32.xlu1 %v710_v54 }
 0x552   : > { %v699_v57 = vpop.xlane.xlu2 %698 }
 0x553   : > { %v703_v59 = vmul.f32 %v699_v57, %v2624_v60 }
 0x554   : > { %v709_v61 = vpop.xlane.xlu1 %708 }
 0x555   : > { %v715_v41 = vmul.f32 %v703_v59, %v703_v59  ;;  %v713_v62 = vmul.f32 %v709_v61, %v2624_v60  ;;  %v719_v16 = vsub.f32 %v693_v43, %v703_v59  ;;  %v756_v43 = vld [vmem:[#allocation2 + $0x120] sm:$0xff] }
 0x556   : > { %836 = vmatpush.msrb.mxu0 %v756_v43 }
 0x557   : > { %v717_v63 = vsub.f32 %v713_v62, %v715_v41 }
 0x559   : > { %v721_v0 = vadd.f32 1e-12, %v717_v63 }
 0x55a   : > { %v702_v1 = vpop.xlane.xlu2 %701 }
 0x55b   : > { %2300 = vrsqrt.f32 %v721_v0  ;;  %v704_v2 = vmul.f32 %v702_v1, %v2624_v60  ;;  %vm729_vm0 = vweird.f32 %v721_v0 }
 0x55c   : > { %v712_v3 = vpop.xlane.xlu1 %711 }
 0x55d   : > { %v716_v4 = vmul.f32 %v704_v2, %v704_v2  ;;  %v714_v5 = vmul.f32 %v712_v3, %v2624_v60  ;;  %v720_v29 = vsub.f32 %v694_v51, %v704_v2  ;;  %v2258_v3 = vld [vmem:[#allocation5 + $0x16] ss:$0 sm:$0xff] }
 0x55f   : > { %v718_v6 = vsub.f32 %v714_v5, %v716_v4 }
 0x561   : > { %v2301_v7 = vpop.eup %2300  ;;  %v722_v8 = vadd.f32 1e-12, %v718_v6 }
 0x562   : > { %v724_v9 = vmul.f32 %v2301_v7, %v721_v0  ;;  %vm730_vm15 = vweird.f32 %v2301_v7 }
 0x563   : > { %2302 = vrsqrt.f32 %v722_v8  ;;  %vm731_vm1 = vmor %vm729_vm0, %vm730_vm15  ;;  %vm739_vm3 = vweird.f32 %v722_v8 }
 0x564   : > { %v725_v10 = vmul.f32 %v2301_v7, %v724_v9 }
 0x566   : > { %v726_v11 = vmul.f32 0.5, %v725_v10 }
 0x568   : > { %v727_v12 = vsub.f32 1.5, %v726_v11 }
 0x569   : > { %v2303_v13 = vpop.eup %2302 }
 0x56a   : > { %v728_v14 = vmul.f32 %v2301_v7, %v727_v12  ;;  %v734_v15 = vmul.f32 %v2303_v13, %v722_v8  ;;  %vm740_vm2 = vweird.f32 %v2303_v13 }
 0x56b   : > { %vm741_vm4 = vmor %vm739_vm3, %vm740_vm2  ;;  %vm1136_vm3 = vcmp.eq.s32.totalorder %v2593_v20, 0 }
 0x56c   : > { %v732_v19 = vsel %vm731_vm1, %v2301_v7, %v728_v14  ;;  %v735_v21 = vmul.f32 %v2303_v13, %v734_v15 }
 0x56d   : > { %v743_v22 = vmul.f32 %v732_v19, %v719_v16 }
 0x56e   : > { %v736_v24 = vmul.f32 0.5, %v735_v21 }
 0x56f   : > { %v746_v25 = vmul.f32 %v2255_v17, %v743_v22 }
 0x570   : > { %v737_v26 = vsub.f32 1.5, %v736_v24 }
 0x571   : > { %v749_v27 = vadd.f32 %v2256_v23, %v746_v25 }
 0x572   : > { %v738_v28 = vmul.f32 %v2303_v13, %v737_v26 }
 0x573   : > { %2131 = vmatmul.msk.f32.vlgmr.msra.gmra.mxu2 %vm345_vm6, %v749_v27 }
 0x574   : > { %v742_v30 = vsel %vm741_vm4, %v2303_v13, %v738_v28 }
 0x575   : > { %v744_v31 = vmul.f32 %v742_v30, %v720_v29 }
 0x577   : > { %v747_v32 = vmul.f32 %v2255_v17, %v744_v31 }
 0x579   : > { %v750_v33 = vadd.f32 %v2256_v23, %v747_v32 }
 0x57b   : > { %2132 = vmatmul.msk.f32.gmra.mxu2 %vm345_vm6, %v750_v33 }
 0x5f6   : > { %v789_v45 = vpop.f32.mrf.mxu2 }
 0x5f7   : > { %v790_v47 = vadd.f32 %v2257_v44, %v789_v45 }
 0x5f9   : > { %v795_v48 = vmul.f32 %v790_v47, %v790_v47 }
 0x5fb   : > { %v797_v49 = vmul.f32 %v795_v48, %v790_v47  ;;  %v1046_v48 = vld [vmem:[#allocation2 + $0x378] sm:$0xff] }
 0x5fd   : > { %v799_v50 = vmul.f32 0.044715, %v797_v49  ;;  %v2712_v49 = vshrl.u32 %v249_v18, 7 }
 0x5fe   : > { %v792_v51 = vpop.f32.mrf.mxu2 }
 0x5ff   : > { %v801_v52 = vadd.f32 %v799_v50, %v790_v47  ;;  %v793_v53 = vadd.f32 %v2257_v44, %v792_v51  ;;  %v932_v44 = vld [vmem:[#allocation2 + $0x320] sm:$0xff]  ;;  %v1045_v51 = vld [vmem:[#allocation2 + $0x370] sm:$0xff]  ;;  %vm1135_vm2 = vcmp.eq.s32.totalorder %v2712_v49, 0 }
 0x600   : > { %954 = vmatpush.msrb.mxu1 %v932_v44  ;;  %vm1137_vm4 = vmand %vm1135_vm2, %vm1136_vm3 }
 0x601   : > { %v803_v54 = vmul.f32 0.7978846, %v801_v52  ;;  %v796_v35 = vmul.f32 %v793_v53, %v793_v53 }
 0x602   : > { %1062 = vmatpush.msra.mxu1 %v1046_v48 }
 0x603   : > { %2304 = vtanh.f32 %v803_v54  ;;  %v798_v55 = vmul.f32 %v796_v35, %v793_v53  ;;  %v1044_v54 = vld [vmem:[#allocation2 + $0x368] sm:$0xff] }
 0x604   : > { %1063 = vmatpush.msra.mxu1 %v1045_v51 }
 0x605   : > { %v800_v56 = vmul.f32 0.044715, %v798_v55  ;;  %v905_v55 = vmul.u32 4, %v2712_v49 }
 0x606   : > { %1064 = vmatpush.msra.mxu1 %v1044_v54  ;;  %v1230_v54 = vld [vmem:[#allocation2 + $0x178] sm:$0xff] }
 0x607   : > { %v802_v57 = vadd.f32 %v800_v56, %v793_v53  ;;  %vm906_vm13 = vcmp.eq.s32.totalorder %v2593_v20, %v905_v55 }
 0x609   : > { %v2305_v58 = vpop.eup %2304  ;;  %v804_v59 = vmul.f32 0.7978846, %v802_v57  ;;  %v2259_v57 = vld [vmem:[#allocation5 + $0x17] ss:$0 sm:$0xff] }
 0x60a   : > { %v807_v61 = vadd.f32 1.0, %v2305_v58 }
 0x60b   : > { %2306 = vtanh.f32 %v804_v59 }
 0x60c   : > { %v809_v41 = vmul.f32 0.5, %v807_v61 }
 0x60e   : > { %v811_v62 = vmul.f32 %v809_v41, %v790_v47  ;;  %v961_v41 = vadd.s32 1, %v905_v55 }
 0x610   : > { %2133 = vmatmul.msk.f32.vlgmr.msrb.gmra.mxu0 %vm814_vm5, %v811_v62  ;;  %v1016_v62 = vadd.s32 2, %v905_v55  ;;  %vm962_vm15 = vcmp.eq.s32.totalorder %v2593_v20, %v961_v41 }
 0x611   : > { %v2307_v63 = vpop.eup %2306 }
 0x612   : > { %v808_v0 = vadd.f32 1.0, %v2307_v63  ;;  %vm1017_vm0 = vcmp.eq.s32.totalorder %v2593_v20, %v1016_v62  ;;  %v1344_v62 = vld [vmem:[#allocation2 + $0x190] sm:$0xff] }
 0x614   : > { %v810_v1 = vmul.f32 0.5, %v808_v0 }
 0x616   : > { %v812_v2 = vmul.f32 %v810_v1, %v793_v53  ;;  %v2260_v1 = vld [vmem:[#allocation5 + $0x18] ss:$0 sm:$0xff] }
 0x618   : > { %2134 = vmatmul.msk.f32.gmra.mxu0 %vm814_vm5, %v812_v2 }
 0x68d   : > { %v838_v4 = vpop.f32.mrf.mxu0 }
 0x68e   : > { %v839_v5 = vadd.f32 %v2258_v3, %v838_v4  ;;  %v2485_v4 = vmov 0.0  }
 0x690   : > { %v2693_v6 = vadd.f32 %v839_v5, %v749_v27  ;;  %v2135_v5 = vsel %vm906_vm13, 1.0, %v2485_v4  ;;  %vm1286_vm13 = vcmask 27648  }
 0x692   : > { %v848_v7 = vsel %vm345_vm6, %v2693_v6, 0.0  ;;  %v856_v10 = vmul.f32 %v2693_v6, %v2693_v6 }
 0x693   : > { %849 = vadd.xlane.f32.xlu1 %v848_v7  ;;  %v2141_v7 = vsel %vm1017_vm0, 1.0, %v2485_v4 }
 0x694   : > { %v858_v12 = vsel %vm345_vm6, %v856_v10, 0.0  ;;  %v990_v10 = vld [vmem:[#allocation2 + $0x350] sm:$0xff] }
 0x695   : > { %v841_v8 = vpop.f32.mrf.mxu0 }
 0x696   : > { %v842_v9 = vadd.f32 %v2258_v3, %v841_v8  ;;  %v1071_v8 = vadd.s32 3, %v905_v55  ;;  %v1228_v55 = vld [vmem:[#allocation2 + $0x168] sm:$0xff] }
 0x698   : > { %v2699_v11 = vadd.f32 %v842_v9, %v750_v33  ;;  %v991_v9 = vld [vmem:[#allocation2 + $0x358] sm:$0xff]  ;;  %vm1072_vm1 = vcmp.eq.s32.totalorder %v2593_v20, %v1071_v8 }
 0x69a   : > { %v851_v13 = vsel %vm345_vm6, %v2699_v11, 0.0  ;;  %v857_v14 = vmul.f32 %v2699_v11, %v2699_v11 }
 0x69b   : > { %859 = vadd.xlane.f32.xlu1 %v858_v12  ;;  %852 = vadd.xlane.f32.xlu2 %v851_v13  ;;  %v2144_v12 = vsel %vm1072_vm1, 1.0, %v2485_v4  ;;  %v988_v13 = vld [vmem:[#allocation2 + $0x340] sm:$0xff] }
 0x69c   : > { %v861_v15 = vsel %vm345_vm6, %v857_v14, 0.0  ;;  %v1043_v14 = vld [vmem:[#allocation2 + $0x360] sm:$0xff] }
 0x69d   : > { %1065 = vmatpush.msra.mxu1 %v1043_v14 }
 0x6a3   : > { %862 = vadd.xlane.f32.xlu2 %v861_v15  ;;  %v1101_v15 = vld [vmem:[#allocation2 + $0x398] sm:$0xff] }
 0x706   : > { %v850_v16 = vpop.xlane.xlu1 %849 }
 0x707   : > { %v854_v17 = vmul.f32 %v850_v16, %v2624_v60  ;;  %v1100_v16 = vld [vmem:[#allocation2 + $0x390] sm:$0xff] }
 0x709   : > { %v866_v22 = vmul.f32 %v854_v17, %v854_v17  ;;  %v870_v35 = vsub.f32 %v2693_v6, %v854_v17  ;;  %v2138_v6 = vsel %vm962_vm15, 1.0, %v2485_v4  ;;  %v1099_v17 = vld [vmem:[#allocation2 + $0x388] sm:$0xff] }
 0x70e   : > { %v853_v19 = vpop.xlane.xlu2 %852  ;;  %v860_v21 = vpop.xlane.xlu1 %859 }
 0x70f   : > { %v864_v23 = vmul.f32 %v860_v21, %v2624_v60  ;;  %v855_v25 = vmul.f32 %v853_v19, %v2624_v60  ;;  %v1098_v19 = vld [vmem:[#allocation2 + $0x380] sm:$0xff] }
 0x711   : > { %v868_v24 = vsub.f32 %v864_v23, %v866_v22  ;;  %v867_v28 = vmul.f32 %v855_v25, %v855_v25  ;;  %v871_v18 = vsub.f32 %v2699_v11, %v855_v25  ;;  %v989_v11 = vld [vmem:[#allocation2 + $0x348] sm:$0xff] }
 0x713   : > { %v872_v26 = vadd.f32 1e-12, %v868_v24 }
 0x715   : > { %2308 = vrsqrt.f32 %v872_v26  ;;  %vm880_vm8 = vweird.f32 %v872_v26 }
 0x716   : > { %v863_v27 = vpop.xlane.xlu2 %862 }
 0x717   : > { %v865_v29 = vmul.f32 %v863_v27, %v2624_v60 }
 0x719   : > { %v869_v30 = vsub.f32 %v865_v29, %v867_v28 }
 0x71b   : > { %v2309_v31 = vpop.eup %2308  ;;  %v873_v32 = vadd.f32 1e-12, %v869_v30  ;;  %v2147_v30 = vsel %vm1137_vm4, 1.0, %v2485_v4 }
 0x71c   : > { %v875_v33 = vmul.f32 %v2309_v31, %v872_v26  ;;  %vm881_vm7 = vweird.f32 %v2309_v31  ;;  %v2261_v26 = vld [vmem:[#allocation5 + $0x27] ss:$0 sm:$0xff] }
 0x71d   : > { %2310 = vrsqrt.f32 %v873_v32  ;;  %vm882_vm9 = vmor %vm880_vm8, %vm881_vm7  ;;  %vm890_vm11 = vweird.f32 %v873_v32  ;;  %vm1141_vm7 = vcmp.eq.s32.totalorder %v2712_v49, %v1140_v42  ;;  %vm1148_vm8 = vcmask 1043456  }
 0x71e   : > { %v876_v34 = vmul.f32 %v2309_v31, %v875_v33  ;;  %v2148_v48 = vsel %vm1141_vm7, 1.0, %v2485_v4 }
 0x720   : > { %v877_v36 = vmul.f32 0.5, %v876_v34 }
 0x722   : > { %v878_v39 = vsub.f32 1.5, %v877_v36 }
 0x723   : > { %v2311_v40 = vpop.eup %2310 }
 0x724   : > { %v885_v43 = vmul.f32 %v2311_v40, %v873_v32  ;;  %v879_v45 = vmul.f32 %v2309_v31, %v878_v39  ;;  %vm891_vm10 = vweird.f32 %v2311_v40 }
 0x725   : > { %vm892_vm12 = vmor %vm890_vm11, %vm891_vm10 }
 0x726   : > { %v886_v47 = vmul.f32 %v2311_v40, %v885_v43  ;;  %v883_v52 = vsel %vm882_vm9, %v2309_v31, %v879_v45  ;;  %vm1197_vm9 = vcmask 257024  }
 0x727   : > { %v894_v58 = vmul.f32 %v883_v52, %v870_v35  ;;  %v1229_v35 = vld [vmem:[#allocation2 + $0x170] sm:$0xff] }
 0x728   : > { %v887_v50 = vmul.f32 0.5, %v886_v47 }
 0x729   : > { %v897_v63 = vmul.f32 %v2259_v57, %v894_v58 }
 0x72a   : > { %v888_v53 = vsub.f32 1.5, %v887_v50 }
 0x72b   : > { %v900_v3 = vadd.f32 %v2260_v1, %v897_v63  ;;  %v1343_v63 = vld [vmem:[#allocation2 + $0x188] sm:$0xff] }
 0x72c   : > { %v889_v56 = vmul.f32 %v2311_v40, %v888_v53 }
 0x72e   : > { %v893_v59 = vsel %vm892_vm12, %v2311_v40, %v889_v56  ;;  %v1227_v56 = vld [vmem:[#allocation2 + $0x160] sm:$0xff] }
 0x72f   : > { %v895_v61 = vmul.f32 %v893_v59, %v871_v18  ;;  %v1345_v59 = vld [vmem:[#allocation2 + $0x198] sm:$0xff] }
 0x731   : > { %v898_v0 = vmul.f32 %v2259_v57, %v895_v61 }
 0x733   : > { %v901_v2 = vadd.f32 %v2260_v1, %v898_v0  ;;  %v1342_v1 = vld [vmem:[#allocation2 + $0x180] sm:$0xff] }
 0x735   : > { %926 = vmatpush.msrb.mxu3 %v901_v2  ;;  %982 = vmatpush.msrb.mxu2 %v901_v2 }
 0x736   : > { %1037 = vmatpush.msra.mxu0 %v901_v2 }
 0x737   : > { %927 = vmatpush.msrb.mxu3 %v900_v3  ;;  %983 = vmatpush.msrb.mxu2 %v900_v3 }
 0x738   : > { %1038 = vmatpush.msra.mxu0 %v900_v3  ;;  %2136 = vmatmul.msk.f32.vlgmr.msrb.gmra.mxu3 %vm483_vm14, %v2135_v5 }
 0x739   : > { %2139 = vmatmul.msk.f32.vlgmr.msrb.gmra.mxu2 %vm483_vm14, %v2138_v6  ;;  %2142 = vmatmul.msk.f32.vlgmr.msra.gmra.mxu0 %vm483_vm14, %v2141_v7 }
 0x73a   : > { %1092 = vmatpush.msra.mxu2 %v901_v2  ;;  %1007 = vmatpush.msra.mxu3 %v991_v9 }
 0x73c   : > { %1093 = vmatpush.msra.mxu2 %v900_v3  ;;  %1008 = vmatpush.msra.mxu3 %v990_v10  ;;  %v2262_v10 = vld [vmem:[#allocation5 + $0x28] ss:$0 sm:$0xff] }
 0x73e   : > { %1009 = vmatpush.msra.mxu3 %v989_v11  ;;  %1250 = vmatpush.msrb.mxu2 %v1230_v54 }
 0x740   : > { %1010 = vmatpush.msra.mxu3 %v988_v13  ;;  %1251 = vmatpush.msrb.mxu2 %v1229_v35 }
 0x741   : > { %2145 = vmatmul.msk.f32.vlgmr.msra.gmra.mxu2 %vm483_vm14, %v2144_v12  ;;  %v2263_v12 = vld [vmem:[#allocation5 + $0x29] ss:$0 sm:$0xff] }
 0x742   : > { %1117 = vmatpush.msrb.mxu3 %v1101_v15  ;;  %1252 = vmatpush.msrb.mxu2 %v1228_v55 }
 0x744   : > { %1118 = vmatpush.msrb.mxu3 %v1100_v16  ;;  %1253 = vmatpush.msrb.mxu2 %v1227_v56 }
 0x746   : > { %1119 = vmatpush.msrb.mxu3 %v1099_v17  ;;  %1362 = vmatpush.msra.mxu2 %v1345_v59  ;;  %v1481_v59 = vld [vmem:[#allocation2 + $0x1e8] sm:$0xff] }
 0x748   : > { %1120 = vmatpush.msrb.mxu3 %v1098_v19  ;;  %1363 = vmatpush.msra.mxu2 %v1344_v62  ;;  %v2763_v19 = vperm.slane %v2662_v46, 1 }
 0x74a   : > { %1364 = vmatpush.msra.mxu2 %v1343_v63 }
 0x74c   : > { %1365 = vmatpush.msra.mxu2 %v1342_v1 }
 0x7b6   : > { %v1040_v23 = vpop.f32.mrf.mxu0 }
 0x7bb   : > { %v929_v21 = vpop.f32.mrf.mxu3 }
 0x7bc   : > { %v985_v22 = vpop.f32.mrf.mxu2  ;;  %2137 = vmatmul.msk.f32.vlgmr.msrb.gmra.mxu1 %vm345_vm6, %v929_v21 }
 0x7bd   : > { %2140 = vmatmul.msk.f32.vlgmr.msra.gmra.mxu3 %vm345_vm6, %v985_v22  ;;  %1189 = vmatpush.msrb.mxu1 %v901_v2 }
 0x7bf   : > { %1190 = vmatpush.msrb.mxu1 %v900_v3 }
 0x7c4   : > { %v1095_v24 = vpop.f32.mrf.mxu2  ;;  %2143 = vmatmul.msk.f32.vlgmr.msra.gmra.mxu1 %vm345_vm6, %v1040_v23 }
 0x7c5   : > { %2146 = vmatmul.msk.f32.vlgmr.msrb.gmra.mxu3 %vm345_vm6, %v1095_v24 }
 0x7cc   : > { %2151 = vmatmul.msk.f32.vlgmr.msrb.gmra.mxu1 %vm483_vm14, %v2147_v30  ;;  %vm1144_vm14 = vcmask 31744  }
 0x839   : > { %v956_v25 = vpop.f32.mrf.mxu1 }
 0x83a   : > { %v960_v27 = vadd.f32 %v2261_v26, %v956_v25 }
 0x840   : > { %v1012_v28 = vpop.f32.mrf.mxu3 }
 0x841   : > { %v1015_v29 = vadd.f32 %v1012_v28, %v960_v27  ;;  %v1067_v31 = vpop.f32.mrf.mxu1 }
 0x843   : > { %v1070_v32 = vadd.f32 %v1067_v31, %v1015_v29 }
 0x848   : > { %v1122_v33 = vpop.f32.mrf.mxu3 }
 0x849   : > { %v1125_v34 = vadd.f32 %v1122_v33, %v1070_v32  ;;  %v1192_v50 = vpop.f32.mrf.mxu1  ;;  %v1234_v32 = vld [vmem:[#allocation2 + $0x1b8] sm:$0xff]  ;;  %v1233_v33 = vld [vmem:[#allocation2 + $0x1b0] sm:$0xff] }
 0x84a   : > { %1332 = vmatpush.msra.mxu1 %v1234_v32 }
 0x84b   : > { %v1126_v36 = vmul.f32 %v1125_v34, %v1125_v34 }
 0x84c   : > { %1333 = vmatpush.msra.mxu1 %v1233_v33 }
 0x84d   : > { %v1127_v37 = vmul.f32 %v1126_v36, %v1125_v34 }
 0x84f   : > { %v1128_v38 = vmul.f32 0.044715, %v1127_v37 }
 0x851   : > { %v1129_v39 = vadd.f32 %v1128_v38, %v1125_v34 }
 0x853   : > { %v1130_v40 = vmul.f32 0.7978846, %v1129_v39 }
 0x855   : > { %2312 = vtanh.f32 %v1130_v40 }
 0x85b   : > { %v2313_v43 = vpop.eup %2312 }
 0x85c   : > { %v1132_v44 = vadd.f32 1.0, %v2313_v43  ;;  %v1231_v43 = vld [vmem:[#allocation2 + $0x1a0] sm:$0xff] }
 0x85e   : > { %v1133_v45 = vmul.f32 0.5, %v1132_v44  ;;  %v1349_v44 = vld [vmem:[#allocation2 + $0x1d8] sm:$0xff] }
 0x860   : > { %v1134_v47 = vmul.f32 %v1133_v45, %v1125_v34  ;;  %v1232_v34 = vld [vmem:[#allocation2 + $0x1a8] sm:$0xff]  ;;  %v1348_v45 = vld [vmem:[#allocation2 + $0x1d0] sm:$0xff] }
 0x861   : > { %1334 = vmatpush.msra.mxu1 %v1232_v34 }
 0x862   : > { %2149 = vmatpush.msk.msrb.mxu0 %vm1148_vm8, %v1134_v47  ;;  %v1347_v47 = vld [vmem:[#allocation2 + $0x1c8] sm:$0xff] }
 0x863   : > { %2150 = vmatmul.msk.f32.vlgmr.msrb.gmra.mxu0 %vm1144_vm14, %v2148_v48  ;;  %1335 = vmatpush.msra.mxu1 %v1231_v43  ;;  %v1346_v48 = vld [vmem:[#allocation2 + $0x1c0] sm:$0xff] }
 0x865   : > { %1440 = vmatpush.msrb.mxu1 %v1349_v44 }
 0x867   : > { %1441 = vmatpush.msrb.mxu1 %v1348_v45 }
 0x869   : > { %1442 = vmatpush.msrb.mxu1 %v1347_v47 }
 0x86b   : > { %1443 = vmatpush.msrb.mxu1 %v1346_v48 }
 0x8e0   : > { %v1169_v51 = vpop.f32.mrf.mxu0 }
 0x8e1   : > { %v1193_v52 = vadd.f32 %v1192_v50, %v1169_v51 }
 0x8e3   : > { %v1198_v20 = vsel %vm1197_vm9, %v1193_v52, 0.0  ;;  %v1202_v53 = vmul.f32 %v1193_v52, %v1193_v52 }
 0x8e4   : > { %1199 = vadd.xlane.f32.xlu2 %v1198_v20  ;;  %v2264_v20 = vld [vmem:[#allocation5 + $0x19] ss:$0 sm:$0xff] }
 0x8e5   : > { %v1203_v49 = vsel %vm1197_vm9, %v1202_v53, 0.0 }
 0x8e6   : > { %1204 = vadd.xlane.f32.xlu0 %v1203_v49 }
 0x957   : > { %v1200_v18 = vpop.xlane.xlu2 %1199 }
 0x958   : > { %v1201_v57 = vmul.f32 %v1200_v18, %v2624_v60 }
 0x959   : > { %v1205_v58 = vpop.xlane.xlu0 %1204 }
 0x95a   : > { %v1207_v61 = vmul.f32 %v1201_v57, %v1201_v57  ;;  %v1206_v41 = vmul.f32 %v1205_v58, %v2624_v60  ;;  %v1209_v9 = vsub.f32 %v1193_v52, %v1201_v57  ;;  %v1483_v57 = vld [vmem:[#allocation2 + $0x1f8] sm:$0xff]  ;;  %v1482_v58 = vld [vmem:[#allocation2 + $0x1f0] sm:$0xff] }
 0x95c   : > { %v1208_v0 = vsub.f32 %v1206_v41, %v1207_v61  ;;  %v1480_v61 = vld [vmem:[#allocation2 + $0x1e0] sm:$0xff] }
 0x95e   : > { %v1210_v2 = vadd.f32 1e-12, %v1208_v0 }
 0x960   : > { %2314 = vrsqrt.f32 %v1210_v2  ;;  %vm1217_vm11 = vweird.f32 %v1210_v2 }
 0x966   : > { %v2315_v3 = vpop.eup %2314 }
 0x967   : > { %v1212_v4 = vmul.f32 %v2315_v3, %v1210_v2  ;;  %vm1218_vm10 = vweird.f32 %v2315_v3 }
 0x968   : > { %vm1219_vm12 = vmor %vm1217_vm11, %vm1218_vm10 }
 0x969   : > { %v1213_v5 = vmul.f32 %v2315_v3, %v1212_v4 }
 0x96b   : > { %v1214_v6 = vmul.f32 0.5, %v1213_v5 }
 0x96d   : > { %v1215_v7 = vsub.f32 1.5, %v1214_v6 }
 0x96f   : > { %v1216_v8 = vmul.f32 %v2315_v3, %v1215_v7 }
 0x971   : > { %v1220_v11 = vsel %vm1219_vm12, %v2315_v3, %v1216_v8 }
 0x972   : > { %v1221_v13 = vmul.f32 %v1220_v11, %v1209_v9  ;;  %v2265_v11 = vld [vmem:[#allocation5 + $0x1a] ss:$0 sm:$0xff] }
 0x974   : > { %v1223_v14 = vmul.f32 %v2262_v10, %v1221_v13 }
 0x976   : > { %v2746_v15 = vadd.f32 %v2263_v12, %v1223_v14  ;;  %v2266_v14 = vld [vmem:[#allocation5 + $0x1b] ss:$0 sm:$0xff] }
 0x978   : > { %2152 = vmatmul.msk.f32.vlgmr.msrb.gmra.mxu2 %vm345_vm6, %v2746_v15  ;;  %2153 = vmatpush.xpose.msk.msra.mxu3 %vm345_vm6, %v2746_v15 }
 0x979   : > { %2155 = vmatpush.msk.msra.mxu0 %vm1148_vm8, %v2746_v15  ;;  %1510 = vmatpush.msrb.mxu2 %v1483_v57 }
 0x97b   : > { %2161 = vmatpush.msk.msrb.mxu0 %vm1148_vm8, %v2746_v15  ;;  %1511 = vmatpush.msrb.mxu2 %v1482_v58 }
 0x97c   : > { %2159 = vmatpush.xpose.msk.msrb.mxu3 %vm345_vm6, %v2746_v15 }
 0x97d   : > { %1512 = vmatpush.msrb.mxu2 %v1481_v59 }
 0x97f   : > { %1513 = vmatpush.msrb.mxu2 %v1480_v61 }
 0x980   : > { %2158 = vmatmul.msk.f32.vlgmr.msra.gmra.mxu2 %vm345_vm6, %v2746_v15 }
 0x9fb   : > { %v1255_v16 = vpop.f32.mrf.mxu2 }
 0x9fc   : > { %2154 = vmatmul.msk.f32.vlgmr.msra.gmra.mxu3 %vm345_vm6, %v1255_v16 }
 0xa03   : > { %v1367_v17 = vpop.f32.mrf.mxu2 }
 0xa04   : > { %2160 = vmatmul.msk.f32.vlgmr.msrb.gmra.mxu3 %vm345_vm6, %v1367_v17  ;;  %v1492_v17 = vld [vmem:[#allocation2 + $0x238] sm:$0xff] }
 0xa05   : > { %1539 = vmatpush.msra.mxu3 %v1492_v17  ;;  %v1590_v17 = vld [vmem:[#allocation2 + $0x298] sm:$0xff] }
 0xa7f   : > { %v1278_v21 = vpop.f32.mrf.mxu3 }
 0xa80   : > { %v1281_v22 = vmul.f32 0.25, %v1278_v21  ;;  %v1491_v21 = vld [vmem:[#allocation2 + $0x230] sm:$0xff] }
 0xa81   : > { %1540 = vmatpush.msra.mxu3 %v1491_v21  ;;  %v1589_v21 = vld [vmem:[#allocation2 + $0x290] sm:$0xff] }
 0xa82   : > { %v1283_v23 = vadd.f32 %v2763_v19, %v1281_v22  ;;  %v1490_v22 = vld [vmem:[#allocation2 + $0x228] sm:$0xff] }
 0xa83   : > { %1541 = vmatpush.msra.mxu3 %v1490_v22  ;;  %v1588_v22 = vld [vmem:[#allocation2 + $0x288] sm:$0xff] }
 0xa84   : > { %v1284_v24 = vmul.f32 1.442695, %v1283_v23  ;;  %v1489_v23 = vld [vmem:[#allocation2 + $0x220] sm:$0xff] }
 0xa85   : > { %1542 = vmatpush.msra.mxu3 %v1489_v23 }
 0xa86   : > { %2316 = vpow2.f32 %v1284_v24  ;;  %v1488_v24 = vld [vmem:[#allocation2 + $0x218] sm:$0xff] }
 0xa87   : > { %v1390_v25 = vpop.f32.mrf.mxu3  ;;  %1543 = vmatpush.msra.mxu3 %v1488_v24 }
 0xa88   : > { %v1393_v26 = vmul.f32 0.25, %v1390_v25  ;;  %v1487_v25 = vld [vmem:[#allocation2 + $0x210] sm:$0xff] }
 0xa89   : > { %1544 = vmatpush.msra.mxu3 %v1487_v25 }
 0xa8a   : > { %v1394_v27 = vadd.f32 %v1393_v26, %v2763_v19  ;;  %v1486_v26 = vld [vmem:[#allocation2 + $0x208] sm:$0xff] }
 0xa8b   : > { %1545 = vmatpush.msra.mxu3 %v1486_v26 }
 0xa8c   : > { %v2317_v28 = vpop.eup %2316  ;;  %v1395_v29 = vmul.f32 1.442695, %v1394_v27  ;;  %v1485_v27 = vld [vmem:[#allocation2 + $0x200] sm:$0xff] }
 0xa8d   : > { %v1287_v30 = vsel %vm1286_vm13, %v2317_v28, 0.0  ;;  %1546 = vmatpush.msra.mxu3 %v1485_v27  ;;  %v1587_v27 = vld [vmem:[#allocation2 + $0x280] sm:$0xff] }
 0xa8e   : > { %2318 = vpow2.f32 %v1395_v29  ;;  %1288 = vadd.xlane.f32.xlu1 %v1287_v30 }
 0xa94   : > { %v2319_v31 = vpop.eup %2318 }
 0xa95   : > { %v1397_v46 = vsel %vm1286_vm13, %v2319_v31, 0.0 }
 0xa96   : > { %1398 = vadd.xlane.f32.xlu2 %v1397_v46 }
 0xb01   : > { %v1289_v36 = vpop.xlane.xlu1 %1288 }
 0xb02   : > { %2320 = vrcp.f32 %v1289_v36 }
 0xb08   : > { %v2321_v37 = vpop.eup %2320 }
 0xb09   : > { %v1291_v38 = vmul.f32 %v2321_v37, %v2317_v28  ;;  %v1399_v39 = vpop.xlane.xlu2 %1398  ;;  %v2267_v28 = vld [vmem:[#allocation5 + $0x1c] ss:$0 sm:$0xff] }
 0xb0a   : > { %2322 = vrcp.f32 %v1399_v39 }
 0xb0b   : > { %2156 = vmatmul.msk.f32.vlgmr.msra.gmra.mxu0 %vm1144_vm14, %v1291_v38 }
 0xb10   : > { %v2323_v40 = vpop.eup %2322 }
 0xb11   : > { %v1401_v42 = vmul.f32 %v2323_v40, %v2319_v31  ;;  %v2268_v40 = vld [vmem:[#allocation5 + $0x1d] ss:$0 sm:$0xff] }
 0xb13   : > { %2162 = vmatmul.msk.f32.vlgmr.msrb.gmra.mxu0 %vm1144_vm14, %v1401_v42 }
 0xb88   : > { %v1314_v50 = vpop.f32.mrf.mxu0 }
 0xb89   : > { %2157 = vmatmul.msk.f32.vlgmr.msra.gmra.mxu1 %vm345_vm6, %v1314_v50  ;;  %v1586_v50 = vld [vmem:[#allocation2 + $0x258] sm:$0xff] }
 0xb8a   : > { %1606 = vmatpush.msra.mxu0 %v1586_v50 }
 0xb90   : > { %v1422_v51 = vpop.f32.mrf.mxu0 }
 0xb91   : > { %2163 = vmatmul.msk.f32.vlgmr.msrb.gmra.mxu1 %vm345_vm6, %v1422_v51  ;;  %v1585_v51 = vld [vmem:[#allocation2 + $0x250] sm:$0xff] }
 0xb92   : > { %1607 = vmatpush.msra.mxu0 %v1585_v51 }
 0xc06   : > { %v1337_v52 = vpop.f32.mrf.mxu1 }
 0xc07   : > { %v1341_v53 = vadd.f32 %v2264_v20, %v1337_v52  ;;  %v1584_v52 = vld [vmem:[#allocation2 + $0x248] sm:$0xff]  ;;  %v1583_v20 = vld [vmem:[#allocation2 + $0x240] sm:$0xff] }
 0xc08   : > { %1608 = vmatpush.msra.mxu0 %v1584_v52 }
 0xc0a   : > { %1609 = vmatpush.msra.mxu0 %v1583_v20 }
 0xc0c   : > { %1686 = vmatpush.msrb.mxu0 %v1590_v17  ;;  %v1839_v17 = vld [vmem:[#allocation2 + $0x2e0] sm:$0xff] }
 0xc0e   : > { %v1445_v49 = vpop.f32.mrf.mxu1  ;;  %1687 = vmatpush.msrb.mxu0 %v1589_v21  ;;  %v2274_v21 = vld [vmem:[#allocation5 + $0x23] ss:$0 sm:$0xff] }
 0xc0f   : > { %v1448_v54 = vadd.f32 %v1445_v49, %v1341_v53 }
 0xc10   : > { %1688 = vmatpush.msrb.mxu0 %v1588_v22 }
 0xc11   : > { %v1449_v35 = vadd.f32 %v1448_v54, %v2746_v15 }
 0xc12   : > { %1689 = vmatpush.msrb.mxu0 %v1587_v27 }
 0xc13   : > { %v1452_v55 = vsel %vm1197_vm9, %v1449_v35, 0.0  ;;  %v1456_v56 = vmul.f32 %v1449_v35, %v1449_v35 }
 0xc14   : > { %1453 = vadd.xlane.f32.xlu0 %v1452_v55 }
 0xc15   : > { %v1457_v18 = vsel %vm1197_vm9, %v1456_v56, 0.0 }
 0xc16   : > { %1458 = vadd.xlane.f32.xlu1 %v1457_v18 }
 0xc87   : > { %v1454_v41 = vpop.xlane.xlu0 %1453 }
 0xc88   : > { %v1455_v62 = vmul.f32 %v1454_v41, %v2624_v60 }
 0xc89   : > { %v1459_v63 = vpop.xlane.xlu1 %1458 }
 0xc8a   : > { %v1461_v0 = vmul.f32 %v1455_v62, %v1455_v62  ;;  %v1460_v1 = vmul.f32 %v1459_v63, %v2624_v60  ;;  %v1463_v10 = vsub.f32 %v1449_v35, %v1455_v62 }
 0xc8c   : > { %v1462_v2 = vsub.f32 %v1460_v1, %v1461_v0  ;;  %v2269_v0 = vld [vmem:[#allocation5 + $0x1e] ss:$0 sm:$0xff] }
 0xc8e   : > { %v1464_v3 = vadd.f32 1e-12, %v1462_v2  ;;  %v2270_v2 = vld [vmem:[#allocation5 + $0x1f] ss:$0 sm:$0xff] }
 0xc90   : > { %2324 = vrsqrt.f32 %v1464_v3  ;;  %vm1471_vm0 = vweird.f32 %v1464_v3 }
 0xc96   : > { %v2325_v4 = vpop.eup %2324 }
 0xc97   : > { %v1466_v5 = vmul.f32 %v2325_v4, %v1464_v3  ;;  %vm1472_vm15 = vweird.f32 %v2325_v4 }
 0xc98   : > { %vm1473_vm1 = vmor %vm1471_vm0, %vm1472_vm15 }
 0xc99   : > { %v1467_v6 = vmul.f32 %v2325_v4, %v1466_v5 }
 0xc9b   : > { %v1468_v7 = vmul.f32 0.5, %v1467_v6  ;;  %v1699_v6 = vld [vmem:[#allocation2 + $0x278] sm:$0xff] }
 0xc9d   : > { %v1469_v8 = vsub.f32 1.5, %v1468_v7  ;;  %v1698_v7 = vld [vmem:[#allocation2 + $0x270] sm:$0xff] }
 0xc9f   : > { %v1470_v9 = vmul.f32 %v2325_v4, %v1469_v8  ;;  %v1697_v8 = vld [vmem:[#allocation2 + $0x268] sm:$0xff] }
 0xca1   : > { %v1474_v12 = vsel %vm1473_vm1, %v2325_v4, %v1470_v9  ;;  %v1696_v9 = vld [vmem:[#allocation2 + $0x260] sm:$0xff] }
 0xca2   : > { %v1475_v13 = vmul.f32 %v1474_v12, %v1463_v10 }
 0xca4   : > { %v1477_v15 = vmul.f32 %v2265_v11, %v1475_v13 }
 0xca6   : > { %v1479_v16 = vadd.f32 %v2266_v14, %v1477_v15 }
 0xca8   : > { %2164 = vmatmul.msk.f32.vlgmr.msrb.gmra.mxu2 %vm345_vm6, %v1479_v16 }
 0xd2b   : > { %v1515_v29 = vpop.f32.mrf.mxu2 }
 0xd2c   : > { %v1516_v30 = vadd.f32 %v2267_v28, %v1515_v29 }
 0xd2e   : > { %v1518_v31 = vmul.f32 %v1516_v30, %v1516_v30 }
 0xd30   : > { %v1519_v46 = vmul.f32 %v1518_v31, %v1516_v30 }
 0xd32   : > { %v1520_v32 = vmul.f32 0.044715, %v1519_v46 }
 0xd34   : > { %v1521_v33 = vadd.f32 %v1520_v32, %v1516_v30 }
 0xd36   : > { %v1522_v34 = vmul.f32 0.7978846, %v1521_v33 }
 0xd38   : > { %2326 = vtanh.f32 %v1522_v34  ;;  %v1703_v34 = vld [vmem:[#allocation2 + $0x2b8] sm:$0xff] }
 0xd3e   : > { %v2327_v36 = vpop.eup %2326 }
 0xd3f   : > { %v1524_v37 = vadd.f32 1.0, %v2327_v36  ;;  %v1702_v36 = vld [vmem:[#allocation2 + $0x2b0] sm:$0xff] }
 0xd41   : > { %v1525_v38 = vmul.f32 0.5, %v1524_v37  ;;  %v1701_v37 = vld [vmem:[#allocation2 + $0x2a8] sm:$0xff] }
 0xd43   : > { %v1526_v39 = vmul.f32 %v1525_v38, %v1516_v30 }
 0xd45   : > { %2165 = vmatmul.msk.f32.vlgmr.msra.gmra.mxu3 %vm814_vm5, %v1526_v39 }
 0xdc8   : > { %v1548_v42 = vpop.f32.mrf.mxu3 }
 0xdc9   : > { %v1549_v43 = vadd.f32 %v2268_v40, %v1548_v42  ;;  %v1700_v42 = vld [vmem:[#allocation2 + $0x2a0] sm:$0xff] }
 0xdcb   : > { %v1551_v44 = vadd.f32 %v1549_v43, %v1479_v16 }
 0xdcd   : > { %v1554_v45 = vsel %vm1197_vm9, %v1551_v44, 0.0  ;;  %v1558_v47 = vmul.f32 %v1551_v44, %v1551_v44 }
 0xdce   : > { %1555 = vadd.xlane.f32.xlu2 %v1554_v45 }
 0xdcf   : > { %v1559_v48 = vsel %vm1197_vm9, %v1558_v47, 0.0 }
 0xdd0   : > { %1560 = vadd.xlane.f32.xlu0 %v1559_v48 }
 0xe41   : > { %v1556_v53 = vpop.xlane.xlu2 %1555 }
 0xe42   : > { %v1557_v49 = vmul.f32 %v1556_v53, %v2624_v60  ;;  %v1837_v53 = vld [vmem:[#allocation2 + $0x2d8] sm:$0xff] }
 0xe43   : > { %v1561_v54 = vpop.xlane.xlu0 %1560 }
 0xe44   : > { %v1563_v35 = vmul.f32 %v1557_v49, %v1557_v49  ;;  %v1562_v55 = vmul.f32 %v1561_v54, %v2624_v60  ;;  %v1565_v63 = vsub.f32 %v1551_v44, %v1557_v49  ;;  %v2271_v44 = vld [vmem:[#allocation5 + $0x20] ss:$0 sm:$0xff]  ;;  %v1836_v49 = vld [vmem:[#allocation2 + $0x2d0] sm:$0xff]  ;;  %v1835_v54 = vld [vmem:[#allocation2 + $0x2c8] sm:$0xff] }
 0xe46   : > { %v1564_v56 = vsub.f32 %v1562_v55, %v1563_v35  ;;  %v1834_v35 = vld [vmem:[#allocation2 + $0x2c0] sm:$0xff] }
 0xe48   : > { %v1566_v18 = vadd.f32 1e-12, %v1564_v56 }
 0xe4a   : > { %2328 = vrsqrt.f32 %v1566_v18  ;;  %vm1573_vm3 = vweird.f32 %v1566_v18 }
 0xe50   : > { %v2329_v57 = vpop.eup %2328 }
 0xe51   : > { %v1568_v58 = vmul.f32 %v2329_v57, %v1566_v18  ;;  %vm1574_vm2 = vweird.f32 %v2329_v57 }
 0xe52   : > { %vm1575_vm4 = vmor %vm1573_vm3, %vm1574_vm2 }
 0xe53   : > { %v1569_v59 = vmul.f32 %v2329_v57, %v1568_v58 }
 0xe55   : > { %v1570_v61 = vmul.f32 0.5, %v1569_v59 }
 0xe57   : > { %v1571_v41 = vsub.f32 1.5, %v1570_v61 }
 0xe59   : > { %v1572_v62 = vmul.f32 %v2329_v57, %v1571_v41 }
 0xe5b   : > { %v1576_v1 = vsel %vm1575_vm4, %v2329_v57, %v1572_v62 }
 0xe5c   : > { %v1577_v3 = vmul.f32 %v1576_v1, %v1565_v63 }
 0xe5e   : > { %v1579_v4 = vmul.f32 %v2269_v0, %v1577_v3 }
 0xe60   : > { %v2784_v5 = vadd.f32 %v2270_v2, %v1579_v4  ;;  %v2272_v4 = vld [vmem:[#allocation5 + $0x21] ss:$0 sm:$0xff] }
 0xe62   : > { %2166 = vmatmul.msk.f32.vlgmr.msra.gmra.mxu0 %vm345_vm6, %v2784_v5  ;;  %2167 = vmatpush.xpose.msk.msra.mxu1 %vm345_vm6, %v2784_v5 }
 0xe63   : > { %2169 = vmatpush.msk.msra.mxu2 %vm1148_vm8, %v2784_v5  ;;  %2175 = vmatpush.msk.msrb.mxu3 %vm1148_vm8, %v2784_v5 }
 0xe64   : > { %1794 = vmatpush.msra.mxu0 %v1703_v34 }
 0xe65   : > { %2173 = vmatpush.xpose.msk.msrb.mxu2 %vm345_vm6, %v2784_v5 }
 0xe66   : > { %1716 = vmatpush.msrb.mxu1 %v1699_v6  ;;  %1795 = vmatpush.msra.mxu0 %v1702_v36 }
 0xe68   : > { %1717 = vmatpush.msrb.mxu1 %v1698_v7  ;;  %1796 = vmatpush.msra.mxu0 %v1701_v37  ;;  %v2273_v7 = vld [vmem:[#allocation5 + $0x22] ss:$0 sm:$0xff] }
 0xe6a   : > { %1718 = vmatpush.msrb.mxu1 %v1697_v8  ;;  %1797 = vmatpush.msra.mxu0 %v1700_v42  ;;  %v1938_v42 = vld [vmem:[#allocation2 + $0x3b0] sm:$0xff] }
 0xe6c   : > { %1719 = vmatpush.msrb.mxu1 %v1696_v9 }
 0xedf   : > { %v1611_v10 = vpop.f32.mrf.mxu0 }
 0xee0   : > { %2168 = vmatmul.msk.f32.vlgmr.msra.gmra.mxu1 %vm345_vm6, %v1611_v10  ;;  %v1846_v10 = vld [vmem:[#allocation2 + $0x318] sm:$0xff] }
 0xee1   : > { %1864 = vmatpush.msra.mxu1 %v1837_v53 }
 0xee3   : > { %1865 = vmatpush.msra.mxu1 %v1836_v49 }
 0xee5   : > { %1866 = vmatpush.msra.mxu1 %v1835_v54 }
 0xee7   : > { %1867 = vmatpush.msra.mxu1 %v1834_v35 }
 0xee8   : > { %2172 = vmatmul.msk.f32.vlgmr.msrb.gmra.mxu1 %vm345_vm6, %v2784_v5 }
 0xf5d   : > { %v1634_v11 = vpop.f32.mrf.mxu1 }
 0xf5e   : > { %v1637_v12 = vmul.f32 0.25, %v1634_v11  ;;  %v1845_v11 = vld [vmem:[#allocation2 + $0x310] sm:$0xff] }
 0xf60   : > { %v1638_v13 = vadd.f32 %v1637_v12, %v2763_v19  ;;  %v1844_v12 = vld [vmem:[#allocation2 + $0x308] sm:$0xff] }
 0xf62   : > { %v1639_v14 = vmul.f32 1.442695, %v1638_v13  ;;  %v1843_v13 = vld [vmem:[#allocation2 + $0x300] sm:$0xff] }
 0xf64   : > { %2330 = vpow2.f32 %v1639_v14  ;;  %v1842_v14 = vld [vmem:[#allocation2 + $0x2f8] sm:$0xff] }
 0xf65   : > { %v1721_v26 = vpop.f32.mrf.mxu1 }
 0xf6a   : > { %v2331_v15 = vpop.eup %2330 }
 0xf6b   : > { %v1641_v16 = vsel %vm1286_vm13, %v2331_v15, 0.0 }
 0xf6c   : > { %1642 = vadd.xlane.f32.xlu1 %v1641_v16  ;;  %v1840_v16 = vld [vmem:[#allocation2 + $0x2e8] sm:$0xff] }
 0xfdf   : > { %v1643_v23 = vpop.xlane.xlu1 %1642 }
 0xfe0   : > { %2332 = vrcp.f32 %v1643_v23 }
 0xfe6   : > { %v2333_v24 = vpop.eup %2332 }
 0xfe7   : > { %v1645_v25 = vmul.f32 %v2333_v24, %v2331_v15  ;;  %v1841_v15 = vld [vmem:[#allocation2 + $0x2f0] sm:$0xff] }
 0xfe9   : > { %2170 = vmatmul.msk.f32.vlgmr.msra.gmra.mxu2 %vm1144_vm14, %v1645_v25 }
 0xfea   : > { %1893 = vmatpush.msra.mxu2 %v1846_v10 }
 0xfec   : > { %1894 = vmatpush.msra.mxu2 %v1845_v11 }
 0xfee   : > { %1895 = vmatpush.msra.mxu2 %v1844_v12 }
 0xff0   : > { %1896 = vmatpush.msra.mxu2 %v1843_v13 }
 0xff1   : > { %2174 = vmatmul.msk.f32.vlgmr.msrb.gmra.mxu2 %vm345_vm6, %v1721_v26 }
 0xff2   : > { %1897 = vmatpush.msra.mxu2 %v1842_v14 }
 0xff4   : > { %1898 = vmatpush.msra.mxu2 %v1841_v15 }
 0xff6   : > { %1899 = vmatpush.msra.mxu2 %v1840_v16 }
 0xff8   : > { %1900 = vmatpush.msra.mxu2 %v1839_v17 }
0x106c   : > { %v1668_v28 = vpop.f32.mrf.mxu2 }
0x106d   : > { %2171 = vmatmul.msk.f32.vlgmr.msrb.gmra.mxu0 %vm345_vm6, %v1668_v28 }
0x1074   : > { %v1744_v29 = vpop.f32.mrf.mxu2 }
0x1075   : > { %v1747_v30 = vmul.f32 0.25, %v1744_v29 }
0x1077   : > { %v1748_v31 = vadd.f32 %v1747_v30, %v2763_v19 }
0x1079   : > { %v1749_v46 = vmul.f32 1.442695, %v1748_v31 }
0x107b   : > { %2334 = vpow2.f32 %v1749_v46 }
0x1081   : > { %v2335_v32 = vpop.eup %2334 }
0x1082   : > { %v1751_v33 = vsel %vm1286_vm13, %v2335_v32, 0.0 }
0x1083   : > { %1752 = vadd.xlane.f32.xlu2 %v1751_v33 }
0x10ea   : > { %v1691_v43 = vpop.f32.mrf.mxu0 }
0x10eb   : > { %v1695_v45 = vadd.f32 %v2271_v44, %v1691_v43  ;;  %v1936_v43 = vld [vmem:[#allocation2 + $0x3a0] sm:$0xff] }
0x10f6   : > { %v1753_v38 = vpop.xlane.xlu2 %1752 }
0x10f7   : > { %2336 = vrcp.f32 %v1753_v38 }
0x10fd   : > { %v2337_v39 = vpop.eup %2336 }
0x10fe   : > { %v1755_v40 = vmul.f32 %v2337_v39, %v2335_v32  ;;  %v2275_v32 = vld [vmem:[#allocation5 + $0x24] ss:$0 sm:$0xff] }
0x1100   : > { %2176 = vmatmul.msk.f32.vlgmr.msrb.gmra.mxu3 %vm1144_vm14, %v1755_v40  ;;  %v1939_v40 = vld [vmem:[#allocation2 + $0x3b8] sm:$0xff] }
0x1101   : > { %1956 = vmatpush.msra.mxu3 %v1939_v40 }
0x1103   : > { %1957 = vmatpush.msra.mxu3 %v1938_v42 }
0x1183   : > { %v1776_v19 = vpop.f32.mrf.mxu3 }
0x1184   : > { %2177 = vmatmul.msk.f32.vlgmr.msra.gmra.mxu0 %vm345_vm6, %v1776_v19  ;;  %v1937_v19 = vld [vmem:[#allocation2 + $0x3a8] sm:$0xff] }
0x1185   : > { %1958 = vmatpush.msra.mxu3 %v1937_v19 }
0x1187   : > { %1959 = vmatpush.msra.mxu3 %v1936_v43 }
0x1201   : > { %v1799_v47 = vpop.f32.mrf.mxu0 }
0x1202   : > { %v1802_v48 = vadd.f32 %v1799_v47, %v1695_v45 }
0x1204   : > { %v1803_v50 = vadd.f32 %v1802_v48, %v2784_v5 }
0x1206   : > { %v1806_v51 = vsel %vm1197_vm9, %v1803_v50, 0.0  ;;  %v1810_v52 = vmul.f32 %v1803_v50, %v1803_v50 }
0x1207   : > { %1807 = vadd.xlane.f32.xlu0 %v1806_v51 }
0x1208   : > { %v1811_v20 = vsel %vm1197_vm9, %v1810_v52, 0.0 }
0x1209   : > { %1812 = vadd.xlane.f32.xlu1 %v1811_v20 }
0x127a   : > { %v1808_v55 = vpop.xlane.xlu0 %1807 }
0x127b   : > { %v1809_v56 = vmul.f32 %v1808_v55, %v2624_v60 }
0x127c   : > { %v1813_v18 = vpop.xlane.xlu1 %1812 }
0x127d   : > { %v1815_v57 = vmul.f32 %v1809_v56, %v1809_v56  ;;  %v1814_v58 = vmul.f32 %v1813_v18, %v2624_v60  ;;  %v1817_v3 = vsub.f32 %v1803_v50, %v1809_v56  ;;  %v2276_v18 = vld [vmem:[#allocation5 + $0x25] ss:$0 sm:$0xff] }
0x127f   : > { %v1816_v59 = vsub.f32 %v1814_v58, %v1815_v57 }
0x1281   : > { %v1818_v61 = vadd.f32 1e-12, %v1816_v59  ;;  %v2277_v59 = vld [vmem:[#allocation5 + $0x26] ss:$0 sm:$0xff] }
0x1283   : > { %2338 = vrsqrt.f32 %v1818_v61  ;;  %vm1825_vm8 = vweird.f32 %v1818_v61 }
0x1289   : > { %v2339_v41 = vpop.eup %2338 }
0x128a   : > { %v1820_v62 = vmul.f32 %v2339_v41, %v1818_v61  ;;  %vm1826_vm7 = vweird.f32 %v2339_v41 }
0x128b   : > { %vm1827_vm14 = vmor %vm1825_vm8, %vm1826_vm7 }
0x128c   : > { %v1821_v63 = vmul.f32 %v2339_v41, %v1820_v62  ;;  %v1967_v62 = vld [vmem:[#allocation2 + $0x3d0] sm:$0xff] }
0x128e   : > { %v1822_v0 = vmul.f32 0.5, %v1821_v63  ;;  %v1966_v63 = vld [vmem:[#allocation2 + $0x3c8] sm:$0xff] }
0x1290   : > { %v1823_v1 = vsub.f32 1.5, %v1822_v0  ;;  %v1965_v0 = vld [vmem:[#allocation2 + $0x3c0] sm:$0xff] }
0x1292   : > { %v1824_v2 = vmul.f32 %v2339_v41, %v1823_v1  ;;  %v1940_v1 = vld [vmem:[#allocation5 + $0x2a] sm:$0x1] }
0x1294   : > { %v1828_v5 = vsel %vm1827_vm14, %v2339_v41, %v1824_v2 }
0x1295   : > { %v1829_v6 = vmul.f32 %v1828_v5, %v1817_v3  ;;  %v1969_v5 = vld [vmem:[#allocation5 + $0x2b] sm:$0x1] }
0x1297   : > { %v1831_v8 = vmul.f32 %v2272_v4, %v1829_v6 }
0x1299   : > { %v1833_v9 = vadd.f32 %v2273_v7, %v1831_v8 }
0x129b   : > { %2178 = vmatmul.msk.f32.vlgmr.msra.gmra.mxu1 %vm345_vm6, %v1833_v9 }
0x1318   : > { %v1869_v22 = vpop.f32.mrf.mxu1 }
0x1319   : > { %v1870_v23 = vadd.f32 %v2274_v21, %v1869_v22 }
0x131b   : > { %v1872_v24 = vmul.f32 %v1870_v23, %v1870_v23 }
0x131d   : > { %v1873_v25 = vmul.f32 %v1872_v24, %v1870_v23 }
0x131f   : > { %v1874_v26 = vmul.f32 0.044715, %v1873_v25 }
0x1321   : > { %v1875_v27 = vadd.f32 %v1874_v26, %v1870_v23 }
0x1323   : > { %v1876_v28 = vmul.f32 0.7978846, %v1875_v27 }
0x1325   : > { %2340 = vtanh.f32 %v1876_v28 }
0x132b   : > { %v2341_v29 = vpop.eup %2340 }
0x132c   : > { %v1878_v30 = vadd.f32 1.0, %v2341_v29 }
0x132e   : > { %v1879_v31 = vmul.f32 0.5, %v1878_v30 }
0x1330   : > { %v1880_v46 = vmul.f32 %v1879_v31, %v1870_v23 }
0x1332   : > { %2179 = vmatmul.msk.f32.vlgmr.msra.gmra.mxu2 %vm814_vm5, %v1880_v46 }
0x13b5   : > { %v1902_v33 = vpop.f32.mrf.mxu2 }
0x13b6   : > { %v1903_v34 = vadd.f32 %v2275_v32, %v1902_v33 }
0x13b8   : > { %v1905_v36 = vadd.f32 %v1903_v34, %v1833_v9 }
0x13ba   : > { %v1908_v37 = vsel %vm1197_vm9, %v1905_v36, 0.0  ;;  %v1912_v38 = vmul.f32 %v1905_v36, %v1905_v36 }
0x13bb   : > { %1909 = vadd.xlane.f32.xlu2 %v1908_v37 }
0x13bc   : > { %v1913_v39 = vsel %vm1197_vm9, %v1912_v38, 0.0 }
0x13bd   : > { %1914 = vadd.xlane.f32.xlu0 %v1913_v39 }
0x142e   : > { %v1910_v44 = vpop.xlane.xlu2 %1909 }
0x142f   : > { %v1911_v45 = vmul.f32 %v1910_v44, %v2624_v60 }
0x1430   : > { %v1915_v47 = vpop.xlane.xlu0 %1914 }
0x1431   : > { %v1917_v48 = vmul.f32 %v1911_v45, %v1911_v45  ;;  %v1916_v50 = vmul.f32 %v1915_v47, %v2624_v60  ;;  %v1919_v56 = vsub.f32 %v1905_v36, %v1911_v45  ;;  %v1968_v60 = vld [vmem:[#allocation2 + $0x3d8] sm:$0xff] }
0x1432   : > { %1985 = vmatpush.msrb.mxu0 %v1968_v60 }
0x1433   : > { %v1918_v51 = vsub.f32 %v1916_v50, %v1917_v48 }
0x1434   : > { %1986 = vmatpush.msrb.mxu0 %v1967_v62 }
0x1435   : > { %v1920_v52 = vadd.f32 1e-12, %v1918_v51 }
0x1436   : > { %1987 = vmatpush.msrb.mxu0 %v1966_v63 }
0x1437   : > { %2342 = vrsqrt.f32 %v1920_v52  ;;  %vm1927_vm9 = vweird.f32 %v1920_v52 }
0x1438   : > { %1988 = vmatpush.msrb.mxu0 %v1965_v0 }
0x143d   : > { %v2343_v20 = vpop.eup %2342 }
0x143e   : > { %v1922_v53 = vmul.f32 %v2343_v20, %v1920_v52  ;;  %vm1928_vm5 = vweird.f32 %v2343_v20 }
0x143f   : > { %vm1929_vm10 = vmor %vm1927_vm9, %vm1928_vm5 }
0x1440   : > { %v1923_v49 = vmul.f32 %v2343_v20, %v1922_v53 }
0x1442   : > { %v1924_v54 = vmul.f32 0.5, %v1923_v49 }
0x1444   : > { %v1925_v35 = vsub.f32 1.5, %v1924_v54 }
0x1446   : > { %v1926_v55 = vmul.f32 %v2343_v20, %v1925_v35 }
0x1448   : > { %v1930_v57 = vsel %vm1929_vm10, %v2343_v20, %v1926_v55 }
0x1449   : > { %v1931_v58 = vmul.f32 %v1930_v57, %v1919_v56 }
0x144b   : > { %v1933_v61 = vmul.f32 %v2276_v18, %v1931_v58 }
0x144d   : > { %v1935_v41 = vadd.f32 %v2277_v59, %v1933_v61 }
0x144f   : > { %2180 = vmatmul.msk.f32.vlgmr.msra.gmra.mxu3 %vm345_vm6, %v1935_v41 }
0x14d2   : > { %v1961_v2 = vpop.f32.mrf.mxu3 }
0x14d3   : > { %v1962_v3 = vadd.f32 %v1961_v2, %v1940_v1 }
0x14d5   : > { %2344 = vtanh.f32 %v1962_v3 }
0x14db   : > { %v2345_v4 = vpop.eup %2344 }
0x14dc   : > { %2181 = vmatmul.msk.f32.vlgmr.msrb.gmra.mxu0 %vm345_vm6, %v2345_v4 }
0x1559   : > { %v1990_v6 = vpop.f32.mrf.mxu0 }
0x155a   : > { %v1991_v7 = vadd.f32 %v1990_v6, %v1969_v5 }
0x155c   : > { %1993 = vst [vmem:[%s236_s10] sm:$0x1] %v1991_v7 }
0x155d   : > { %2433 = shalt.err (!%p2430_p8)
}
0x155e   : > { %2193 = dma.vmem_to_hbm [thread:$0]  (%p2549_p5), %s2006_s11, 16, %s2008_s12, %s1995_s13  }
0x155f PF: > { %p2210_p9 = scmp.ge.s32.totalorder %s2476_s18, 2  ;;  %s2019_s29 = sand.u32 1, %s2464_s15  }
0x1560   : > { %s2020_s30 = scalar_lea.sflag [#allocation4], %s2019_s29 }
0x1561   : > { %p2203_p10 = pnand %p2210_p9, %p2553_p6 }
0x1563   : > { %p2204_p11 = pneg %p2203_p10 }
0x1565   : > { %2459 = dma.done.wait (%p2204_p11), %s2020_s30, 16  }
0x1566   : > { %2461 = vsyncadd (%p2204_p11), %s2020_s30, 4294967280  ;;  %p16_p12 = scmp.ge.s32.totalorder %s2536_s21, 4   ;;  %s2861_s15 = smov %s2468_s16 }
0x1567   : > { %s2862_s16 = smov %s2472_s17  ;;  %s2863_s17 = smov %s2547_s24 }
0x1568   : > { %s2864_s18 = smov %s2536_s21  ;;  %18 = sbr.rel (!%p16_p12) target bundleno = 5 (0x5), region = 83 }
0x156d   :  { %2025 = vsyncpa [#allocation3], 1 }
0x156e   :  { %2027 = vsyncpa [#allocation3 + $0x1], 1 }
0x156f   :  { %2028 = vsyncpa [#allocation6], 1 }
0x1570   :  { %2029 = vsyncpa [#allocation4], 1 }
0x1571   :  { %2031 = vsyncpa [#allocation4 + $0x1], 1 }

</bundles_post_ra>
